<compile_context>
chip_gen: v5e
topology: v5e:2x2
jax: 0.10.0
libtpu: 0.0.40
codegen_flags: <defaults>
</compile_context>

<pallas_src>
import functools
from typing import NamedTuple

import jax
import jax.numpy as jnp
from jax.experimental import pallas as pl
from jax.experimental.pallas import tpu as pltpu


def _round_up(x, m):
    return ((x + m - 1) // m) * m


class Meta(NamedTuple):
    """Static (hashable) layout info for the packed parameter slabs."""
    H: int
    O: int
    r_ih: int     # row offsets inside the weight slab
    r_hh: int
    r_f2h: int
    r_out: int
    c_f2h: int    # lane offsets inside the bias slab
    c_g: int
    c_out: int


# ----------------------------------------------------------------------------
# Parameter packing (done once, outside the hot path):
#   weight slab (rows, 128):  [W_ih (V) | W_hh (H) | W_f2h (D) | W_out (H)]  row sections
#   bias   slab (1, 3*128) :  [b_f2h | b_gates | b_out]                      128-aligned
# ----------------------------------------------------------------------------
def pack_params(params, matmul_dtype=jnp.float32):
    w_ih, w_hh = params["w_ih"], params["w_hh"]
    w_f2h, w_out = params["w_f2h"], params["w_out"]
    V, G = w_ih.shape
    H = w_hh.shape[0]
    D = w_f2h.shape[0]
    O = w_out.shape[1]
    assert G == 4 * H

    r_ih = 0
    r_hh = r_ih + _round_up(V, 8)
    r_f2h = r_hh + _round_up(H, 8)
    r_out = r_f2h + _round_up(D, 8)
    n_rows = r_out + _round_up(H, 8)
    n_cols = _round_up(max(G, H, O), 128)

    w_slab = jnp.zeros((n_rows, n_cols), matmul_dtype)
    w_slab = w_slab.at[r_ih:r_ih + V, 0:G].set(w_ih.astype(matmul_dtype))
    w_slab = w_slab.at[r_hh:r_hh + H, 0:G].set(w_hh.astype(matmul_dtype))
    w_slab = w_slab.at[r_f2h:r_f2h + D, 0:H].set(w_f2h.astype(matmul_dtype))
    w_slab = w_slab.at[r_out:r_out + H, 0:O].set(w_out.astype(matmul_dtype))

    c_f2h = 0
    c_g = c_f2h + _round_up(H, 128)
    c_out = c_g + _round_up(G, 128)
    n_bcols = c_out + _round_up(O, 128)

    b_slab = jnp.zeros((1, n_bcols), jnp.float32)
    b_slab = b_slab.at[:, c_f2h:c_f2h + H].set(params["b_f2h"].astype(jnp.float32))
    b_slab = b_slab.at[:, c_g:c_g + G].set(params["b_gates"].astype(jnp.float32))
    b_slab = b_slab.at[:, c_out:c_out + O].set(params["b_out"].astype(jnp.float32))

    meta = Meta(H=H, O=O, r_ih=r_ih, r_hh=r_hh, r_f2h=r_f2h, r_out=r_out,
                c_f2h=c_f2h, c_g=c_g, c_out=c_out)
    return w_slab, b_slab, meta


# ----------------------------------------------------------------------------
# Fused kernel: feat2hidden + hoisted input projection + LSTM recurrence +
#               deferred batched readout (log_softmax) + fused greedy argmax.
# ----------------------------------------------------------------------------
def _lm_deep_kernel(x_ref, conds_ref, w_ref, b_ref, out_ref, dec_ref, h_all_ref, *, meta):
    B, T, V = x_ref.shape
    D = conds_ref.shape[1]
    H = meta.H
    G = 4 * H
    O = out_ref.shape[2]
    f32 = jnp.float32

    # --- static ref-slices into the packed slabs (load only what is needed) ---
    w_ih = w_ref[meta.r_ih:meta.r_ih + V, 0:G]
    w_hh = w_ref[meta.r_hh:meta.r_hh + H, 0:G]            # resident across the loop
    w_f2h = w_ref[meta.r_f2h:meta.r_f2h + D, 0:H]
    w_out = w_ref[meta.r_out:meta.r_out + H, 0:O]
    b_f2h = b_ref[:, meta.c_f2h:meta.c_f2h + H]
    b_g = b_ref[:, meta.c_g:meta.c_g + G]
    b_out = b_ref[:, meta.c_out:meta.c_out + O]

    # --- fused feat2hidden: h0 = conds @ W_f2h + b_f2h ------------------------
    h = jnp.dot(conds_ref[...], w_f2h, preferred_element_type=f32) + b_f2h     # (B, H) f32

    # --- hoisted input projection: one MXU call for all timesteps -------------
    x_flat = x_ref[...].reshape(B * T, V)
    gx = jnp.dot(x_flat, w_ih, preferred_element_type=f32) + b_g               # (B*T, 4H) f32
    gx = gx.reshape(B, T, G)
    gx_t = [gx[:, t, :] for t in range(T)]     # pre-sliced: stays off the h-dependency chain

    # --- sequential recurrence (T static & small: unrolled, h/c in registers) -
    c = jnp.zeros((B, H), f32)
    for t in range(T):
        g = gx_t[t] + jnp.dot(h.astype(w_hh.dtype), w_hh,
                              preferred_element_type=f32)                      # (B, 4H) f32
        # full-row activations (2 EUP passes), then slice in torch order i,f,g,o
        sig = jax.nn.sigmoid(g)
        tnh = jnp.tanh(g)
        i_g = sig[:, 0 * H:1 * H]
        f_g = sig[:, 1 * H:2 * H]
        g_g = tnh[:, 2 * H:3 * H]
        o_g = sig[:, 3 * H:4 * H]
        c = f_g * c + i_g * g_g
        h = o_g * jnp.tanh(c)
        h_all_ref[:, t, :] = h          # tiny per-step store, overlaps the recurrence

    # --- deferred batched readout: one MXU call ------------------------------
    h_all = h_all_ref[...].reshape(B * T, H)
    logits = jnp.dot(h_all.astype(w_out.dtype), w_out,
                     preferred_element_type=f32) + b_out                       # (B*T, O) f32
    logits = logits.reshape(B, T, O)

    m = jnp.max(logits, axis=-1, keepdims=True)

    # fused greedy decode: first-occurrence argmax over raw logits (log_softmax is monotone)
    idx = jax.lax.broadcasted_iota(jnp.int32, logits.shape, 2)
    dec_ref[...] = jnp.min(jnp.where(logits == m, idx, O), axis=-1, keepdims=True)

    # log_softmax (reuses m)
    z = logits - m
    out_ref[...] = z - jnp.log(jnp.sum(jnp.exp(z), axis=-1, keepdims=True))


# ----------------------------------------------------------------------------
# Wrapper: LM_deep.forward (vanilla branch) on pre-packed params.
#   matmul_dtype=jnp.bfloat16 puts matmul operands on the single-pass bf16 MXU
#   path (works on v5e/v6e/v7x); accumulation + gate/softmax math stay f32.
# ----------------------------------------------------------------------------
@functools.partial(jax.jit, static_argnames=("meta", "matmul_dtype"))
def lm_deep_forward(input_seq, conds_batches, w_slab, b_slab, *, meta,
                    matmul_dtype=jnp.float32):
    B, T, V = input_seq.shape
    D = conds_batches.shape[1]
    H, O = meta.H, meta.O

    x = input_seq.astype(matmul_dtype)
    conds = conds_batches.astype(matmul_dtype)

    def full(shape):
        return pl.BlockSpec(shape, lambda *_: (0,) * len(shape))

    output_all, dec3 = pl.pallas_call(
        functools.partial(_lm_deep_kernel, meta=meta),
        out_shape=(jax.ShapeDtypeStruct((B, T, O), jnp.float32),
                   jax.ShapeDtypeStruct((B, T, 1), jnp.int32)),
        in_specs=[
            full((B, T, V)),        # input_seq (batch-first, no wrapper transpose)
            full((B, D)),           # conds_batches
            full(w_slab.shape),     # packed weights [W_ih | W_hh | W_f2h | W_out]
            full(b_slab.shape),     # packed biases  [b_f2h | b_gates | b_out]
        ],
        out_specs=(full((B, T, O)), full((B, T, 1))),
        scratch_shapes=[pltpu.VMEM((B, T, H), jnp.float32)],   # per-step h_t collection
    )(x, conds, w_slab, b_slab)

    decoded_words = dec3.reshape(B, T)   # drop trailing singleton (metadata-only reshape)
    return output_all, decoded_words


# ----------------------------------------------------------------------------
# Pure-JAX reference (sanity check only)
# ----------------------------------------------------------------------------
def _reference(input_seq, conds_batches, params):
    h = conds_batches @ params["w_f2h"] + params["b_f2h"][0]
    c = jnp.zeros_like(h)
    H = h.shape[1]
    outs = []
    for t in range(input_seq.shape[1]):
        x_t = input_seq[:, t, :]
        gates = x_t @ params["w_ih"] + h @ params["w_hh"] + params["b_gates"][0]
        i_g = jax.nn.sigmoid(gates[:, 0 * H:1 * H])
        f_g = jax.nn.sigmoid(gates[:, 1 * H:2 * H])
        g_g = jnp.tanh(gates[:, 2 * H:3 * H])
        o_g = jax.nn.sigmoid(gates[:, 3 * H:4 * H])
        c = f_g * c + i_g * g_g
        h = o_g * jnp.tanh(c)
        logits = h @ params["w_out"] + params["b_out"][0]
        outs.append(jax.nn.log_softmax(logits, axis=-1))
    out = jnp.stack(outs, axis=1)
    return out, jnp.argmax(out, axis=-1)


if __name__ == "__main__":
    # LM_deep(dec_type='vanilla', input_size=V, output_size=O, hidden_size=H,
    #         d_size=D, n_layer=1), batch=2, seq=8
    B, T = 2, 8
    V, O, H, D = 24, 24, 32, 8

    key = jax.random.PRNGKey(0)
    ks = jax.random.split(key, 9)

    params = {
        "w_f2h":   jax.random.normal(ks[0], (D, H), jnp.float32) * 0.1,
        "b_f2h":   jax.random.normal(ks[1], (1, H), jnp.float32) * 0.1,
        "w_ih":    jax.random.normal(ks[2], (V, 4 * H), jnp.float32) * 0.1,
        "w_hh":    jax.random.normal(ks[3], (H, 4 * H), jnp.float32) * 0.1,
        "b_gates": jax.random.normal(ks[4], (1, 4 * H), jnp.float32) * 0.1,
        "w_out":   jax.random.normal(ks[5], (H, O), jnp.float32) * 0.1,
        "b_out":   jax.random.normal(ks[6], (1, O), jnp.float32) * 0.1,
    }

    input_seq = jax.random.normal(ks[7], (B, T, V), jnp.float32)     # embedded tokens
    conds_batches = jax.random.normal(ks[8], (B, D), jnp.float32)    # dialogue-act features

    ref_out, ref_dec = _reference(input_seq, conds_batches, params)

    # f32 matmul path (exact check)
    w_slab, b_slab, meta = pack_params(params, matmul_dtype=jnp.float32)
    output_all, decoded_words = lm_deep_forward(
        input_seq, conds_batches, w_slab, b_slab, meta=meta, matmul_dtype=jnp.float32)
    output_all = jax.block_until_ready(output_all)
    decoded_words = jax.block_until_ready(decoded_words)
    assert output_all.shape == (B, T, O)
    assert decoded_words.shape == (B, T)
    assert jnp.allclose(output_all, ref_out, atol=1e-4, rtol=1e-4)
    assert jnp.array_equal(decoded_words, ref_dec)

    # bf16 MXU-operand path (single-pass MXU on v5e/v6e/v7x), f32 accumulation (loose check)
    w_slab_bf, b_slab_bf, meta_bf = pack_params(params, matmul_dtype=jnp.bfloat16)
    out_bf16, dec_bf16 = lm_deep_forward(
        input_seq, conds_batches, w_slab_bf, b_slab_bf, meta=meta_bf,
        matmul_dtype=jnp.bfloat16)
    out_bf16 = jax.block_until_ready(out_bf16)
    assert out_bf16.shape == (B, T, O)
    assert jnp.allclose(out_bf16, ref_out, atol=5e-2, rtol=5e-2)

    print("KERNEL_OK")
</pallas_src>

<mosaic_0001>
module attributes {stable_mosaic.version = 11 : i64} {
  func.func @_lm_deep_kernel(%arg0: memref<2x8x24xf32, #tpu.memory_space<vmem>>, %arg1: memref<2x8xf32, #tpu.memory_space<vmem>>, %arg2: memref<96x128xf32, #tpu.memory_space<vmem>>, %arg3: memref<1x384xf32, #tpu.memory_space<vmem>>, %arg4: memref<2x8x24xf32, #tpu.memory_space<vmem>>, %arg5: memref<2x8x1xi32, #tpu.memory_space<vmem>>, %arg6: memref<2x8x32xf32, #tpu.memory_space<vmem>>) attributes {dimension_semantics = [], scalar_prefetch = 0 : i64, scratch_operands = 1 : i64, tpu.core_type = #tpu.core_type<tc>} {
    %c0 = arith.constant 0 : index
    %c0_0 = arith.constant 0 : index
    %0 = vector.load %arg2[%c0, %c0_0] : memref<96x128xf32, #tpu.memory_space<vmem>>, vector<24x128xf32>
    %c24 = arith.constant 24 : index
    %c0_1 = arith.constant 0 : index
    %1 = vector.load %arg2[%c24, %c0_1] : memref<96x128xf32, #tpu.memory_space<vmem>>, vector<32x128xf32>
    %c56 = arith.constant 56 : index
    %c0_2 = arith.constant 0 : index
    %2 = vector.load %arg2[%c56, %c0_2] : memref<96x128xf32, #tpu.memory_space<vmem>>, vector<8x32xf32>
    %c64 = arith.constant 64 : index
    %c0_3 = arith.constant 0 : index
    %3 = vector.load %arg2[%c64, %c0_3] : memref<96x128xf32, #tpu.memory_space<vmem>>, vector<32x24xf32>
    %c0_4 = arith.constant 0 : index
    %c0_5 = arith.constant 0 : index
    %4 = vector.load %arg3[%c0_4, %c0_5] : memref<1x384xf32, #tpu.memory_space<vmem>>, vector<1x32xf32>
    %c0_6 = arith.constant 0 : index
    %c128 = arith.constant 128 : index
    %5 = vector.load %arg3[%c0_6, %c128] : memref<1x384xf32, #tpu.memory_space<vmem>>, vector<1x128xf32>
    %c0_7 = arith.constant 0 : index
    %c256 = arith.constant 256 : index
    %6 = vector.load %arg3[%c0_7, %c256] : memref<1x384xf32, #tpu.memory_space<vmem>>, vector<1x24xf32>
    %c0_8 = arith.constant 0 : index
    %c0_9 = arith.constant 0 : index
    %7 = vector.load %arg1[%c0_8, %c0_9] : memref<2x8xf32, #tpu.memory_space<vmem>>, vector<2x8xf32>
    %cst = arith.constant dense<0.000000e+00> : vector<2x32xf32>
    %8 = tpu.matmul %7, %2, %cst {dimension_numbers = #tpu.dot_dimension_numbers<[1], [0], [0], [1], [0, 0, 1, 1], [], []>} : vector<2x8xf32>, vector<8x32xf32>, vector<2x32xf32> -> vector<2x32xf32>
    %9 = vector.broadcast %4 : vector<1x32xf32> to vector<2x32xf32>
    %10 = arith.addf %8, %9 : vector<2x32xf32>
    %c0_10 = arith.constant 0 : index
    %c0_11 = arith.constant 0 : index
    %c0_12 = arith.constant 0 : index
    %11 = vector.load %arg0[%c0_10, %c0_11, %c0_12] : memref<2x8x24xf32, #tpu.memory_space<vmem>>, vector<2x8x24xf32>
    %12 = vector.shape_cast %11 : vector<2x8x24xf32> to vector<16x24xf32>
    %cst_13 = arith.constant dense<0.000000e+00> : vector<16x128xf32>
    %13 = tpu.matmul %12, %0, %cst_13 {dimension_numbers = #tpu.dot_dimension_numbers<[1], [0], [0], [1], [0, 0, 1, 1], [], []>} : vector<16x24xf32>, vector<24x128xf32>, vector<16x128xf32> -> vector<16x128xf32>
    %14 = vector.broadcast %5 : vector<1x128xf32> to vector<16x128xf32>
    %15 = arith.addf %13, %14 : vector<16x128xf32>
    %16 = vector.shape_cast %15 : vector<16x128xf32> to vector<2x8x128xf32>
    %17 = vector.extract_strided_slice %16 {offsets = [0, 0, 0], sizes = [2, 1, 128], strides = [1, 1, 1]} : vector<2x8x128xf32> to vector<2x1x128xf32>
    %18 = vector.shape_cast %17 : vector<2x1x128xf32> to vector<2x128xf32>
    %19 = vector.extract_strided_slice %16 {offsets = [0, 1, 0], sizes = [2, 1, 128], strides = [1, 1, 1]} : vector<2x8x128xf32> to vector<2x1x128xf32>
    %20 = vector.shape_cast %19 : vector<2x1x128xf32> to vector<2x128xf32>
    %21 = vector.extract_strided_slice %16 {offsets = [0, 2, 0], sizes = [2, 1, 128], strides = [1, 1, 1]} : vector<2x8x128xf32> to vector<2x1x128xf32>
    %22 = vector.shape_cast %21 : vector<2x1x128xf32> to vector<2x128xf32>
    %23 = vector.extract_strided_slice %16 {offsets = [0, 3, 0], sizes = [2, 1, 128], strides = [1, 1, 1]} : vector<2x8x128xf32> to vector<2x1x128xf32>
    %24 = vector.shape_cast %23 : vector<2x1x128xf32> to vector<2x128xf32>
    %25 = vector.extract_strided_slice %16 {offsets = [0, 4, 0], sizes = [2, 1, 128], strides = [1, 1, 1]} : vector<2x8x128xf32> to vector<2x1x128xf32>
    %26 = vector.shape_cast %25 : vector<2x1x128xf32> to vector<2x128xf32>
    %27 = vector.extract_strided_slice %16 {offsets = [0, 5, 0], sizes = [2, 1, 128], strides = [1, 1, 1]} : vector<2x8x128xf32> to vector<2x1x128xf32>
    %28 = vector.shape_cast %27 : vector<2x1x128xf32> to vector<2x128xf32>
    %29 = vector.extract_strided_slice %16 {offsets = [0, 6, 0], sizes = [2, 1, 128], strides = [1, 1, 1]} : vector<2x8x128xf32> to vector<2x1x128xf32>
    %30 = vector.shape_cast %29 : vector<2x1x128xf32> to vector<2x128xf32>
    %31 = vector.extract_strided_slice %16 {offsets = [0, 7, 0], sizes = [2, 1, 128], strides = [1, 1, 1]} : vector<2x8x128xf32> to vector<2x1x128xf32>
    %32 = vector.shape_cast %31 : vector<2x1x128xf32> to vector<2x128xf32>
    %cst_14 = arith.constant 0.000000e+00 : f32
    %33 = vector.broadcast %cst_14 : f32 to vector<2x32xf32>
    %cst_15 = arith.constant dense<0.000000e+00> : vector<2x128xf32>
    %34 = tpu.matmul %10, %1, %cst_15 {dimension_numbers = #tpu.dot_dimension_numbers<[1], [0], [0], [1], [0, 0, 1, 1], [], []>} : vector<2x32xf32>, vector<32x128xf32>, vector<2x128xf32> -> vector<2x128xf32>
    %35 = arith.addf %18, %34 : vector<2x128xf32>
    %36 = arith.negf %35 : vector<2x128xf32>
    %37 = math.exp %36 : vector<2x128xf32>
    %cst_16 = arith.constant 1.000000e+00 : f32
    %38 = vector.broadcast %cst_16 : f32 to vector<2x128xf32>
    %39 = arith.addf %38, %37 : vector<2x128xf32>
    %40 = arith.divf %38, %39 : vector<2x128xf32>
    %41 = math.tanh %35 : vector<2x128xf32>
    %42 = vector.extract_strided_slice %40 {offsets = [0, 0], sizes = [2, 32], strides = [1, 1]} : vector<2x128xf32> to vector<2x32xf32>
    %43 = vector.extract_strided_slice %40 {offsets = [0, 32], sizes = [2, 32], strides = [1, 1]} : vector<2x128xf32> to vector<2x32xf32>
    %44 = vector.extract_strided_slice %41 {offsets = [0, 64], sizes = [2, 32], strides = [1, 1]} : vector<2x128xf32> to vector<2x32xf32>
    %45 = vector.extract_strided_slice %40 {offsets = [0, 96], sizes = [2, 32], strides = [1, 1]} : vector<2x128xf32> to vector<2x32xf32>
    %46 = arith.mulf %43, %33 : vector<2x32xf32>
    %47 = arith.mulf %42, %44 : vector<2x32xf32>
    %48 = arith.addf %46, %47 : vector<2x32xf32>
    %49 = math.tanh %48 : vector<2x32xf32>
    %50 = arith.mulf %45, %49 : vector<2x32xf32>
    %c0_17 = arith.constant 0 : index
    %c0_18 = arith.constant 0 : index
    %c0_19 = arith.constant 0 : index
    %51 = vector.load %arg6[%c0_17, %c0_18, %c0_19] : memref<2x8x32xf32, #tpu.memory_space<vmem>>, vector<2x1x32xf32>
    %52 = vector.shape_cast %51 : vector<2x1x32xf32> to vector<2x32xf32>
    %53 = vector.shape_cast %50 : vector<2x32xf32> to vector<2x1x32xf32>
    tpu.vector_store %arg6[%c0_17, %c0_18, %c0_19], %53 {strides = array<i32>} : memref<2x8x32xf32, #tpu.memory_space<vmem>>, vector<2x1x32xf32>,
    %cst_20 = arith.constant dense<0.000000e+00> : vector<2x128xf32>
    %54 = tpu.matmul %50, %1, %cst_20 {dimension_numbers = #tpu.dot_dimension_numbers<[1], [0], [0], [1], [0, 0, 1, 1], [], []>} : vector<2x32xf32>, vector<32x128xf32>, vector<2x128xf32> -> vector<2x128xf32>
    %55 = arith.addf %20, %54 : vector<2x128xf32>
    %56 = arith.negf %55 : vector<2x128xf32>
    %57 = math.exp %56 : vector<2x128xf32>
    %cst_21 = arith.constant 1.000000e+00 : f32
    %58 = vector.broadcast %cst_21 : f32 to vector<2x128xf32>
    %59 = arith.addf %58, %57 : vector<2x128xf32>
    %60 = arith.divf %58, %59 : vector<2x128xf32>
    %61 = math.tanh %55 : vector<2x128xf32>
    %62 = vector.extract_strided_slice %60 {offsets = [0, 0], sizes = [2, 32], strides = [1, 1]} : vector<2x128xf32> to vector<2x32xf32>
    %63 = vector.extract_strided_slice %60 {offsets = [0, 32], sizes = [2, 32], strides = [1, 1]} : vector<2x128xf32> to vector<2x32xf32>
    %64 = vector.extract_strided_slice %61 {offsets = [0, 64], sizes = [2, 32], strides = [1, 1]} : vector<2x128xf32> to vector<2x32xf32>
    %65 = vector.extract_strided_slice %60 {offsets = [0, 96], sizes = [2, 32], strides = [1, 1]} : vector<2x128xf32> to vector<2x32xf32>
    %66 = arith.mulf %63, %48 : vector<2x32xf32>
    %67 = arith.mulf %62, %64 : vector<2x32xf32>
    %68 = arith.addf %66, %67 : vector<2x32xf32>
    %69 = math.tanh %68 : vector<2x32xf32>
    %70 = arith.mulf %65, %69 : vector<2x32xf32>
    %c0_22 = arith.constant 0 : index
    %c1 = arith.constant 1 : index
    %c0_23 = arith.constant 0 : index
    %71 = vector.load %arg6[%c0_22, %c1, %c0_23] : memref<2x8x32xf32, #tpu.memory_space<vmem>>, vector<2x1x32xf32>
    %72 = vector.shape_cast %71 : vector<2x1x32xf32> to vector<2x32xf32>
    %73 = vector.shape_cast %70 : vector<2x32xf32> to vector<2x1x32xf32>
    tpu.vector_store %arg6[%c0_22, %c1, %c0_23], %73 {strides = array<i32>} : memref<2x8x32xf32, #tpu.memory_space<vmem>>, vector<2x1x32xf32>,
    %cst_24 = arith.constant dense<0.000000e+00> : vector<2x128xf32>
    %74 = tpu.matmul %70, %1, %cst_24 {dimension_numbers = #tpu.dot_dimension_numbers<[1], [0], [0], [1], [0, 0, 1, 1], [], []>} : vector<2x32xf32>, vector<32x128xf32>, vector<2x128xf32> -> vector<2x128xf32>
    %75 = arith.addf %22, %74 : vector<2x128xf32>
    %76 = arith.negf %75 : vector<2x128xf32>
    %77 = math.exp %76 : vector<2x128xf32>
    %cst_25 = arith.constant 1.000000e+00 : f32
    %78 = vector.broadcast %cst_25 : f32 to vector<2x128xf32>
    %79 = arith.addf %78, %77 : vector<2x128xf32>
    %80 = arith.divf %78, %79 : vector<2x128xf32>
    %81 = math.tanh %75 : vector<2x128xf32>
    %82 = vector.extract_strided_slice %80 {offsets = [0, 0], sizes = [2, 32], strides = [1, 1]} : vector<2x128xf32> to vector<2x32xf32>
    %83 = vector.extract_strided_slice %80 {offsets = [0, 32], sizes = [2, 32], strides = [1, 1]} : vector<2x128xf32> to vector<2x32xf32>
    %84 = vector.extract_strided_slice %81 {offsets = [0, 64], sizes = [2, 32], strides = [1, 1]} : vector<2x128xf32> to vector<2x32xf32>
    %85 = vector.extract_strided_slice %80 {offsets = [0, 96], sizes = [2, 32], strides = [1, 1]} : vector<2x128xf32> to vector<2x32xf32>
    %86 = arith.mulf %83, %68 : vector<2x32xf32>
    %87 = arith.mulf %82, %84 : vector<2x32xf32>
    %88 = arith.addf %86, %87 : vector<2x32xf32>
    %89 = math.tanh %88 : vector<2x32xf32>
    %90 = arith.mulf %85, %89 : vector<2x32xf32>
    %c0_26 = arith.constant 0 : index
    %c2 = arith.constant 2 : index
    %c0_27 = arith.constant 0 : index
    %91 = vector.load %arg6[%c0_26, %c2, %c0_27] : memref<2x8x32xf32, #tpu.memory_space<vmem>>, vector<2x1x32xf32>
    %92 = vector.shape_cast %91 : vector<2x1x32xf32> to vector<2x32xf32>
    %93 = vector.shape_cast %90 : vector<2x32xf32> to vector<2x1x32xf32>
    tpu.vector_store %arg6[%c0_26, %c2, %c0_27], %93 {strides = array<i32>} : memref<2x8x32xf32, #tpu.memory_space<vmem>>, vector<2x1x32xf32>,
    %cst_28 = arith.constant dense<0.000000e+00> : vector<2x128xf32>
    %94 = tpu.matmul %90, %1, %cst_28 {dimension_numbers = #tpu.dot_dimension_numbers<[1], [0], [0], [1], [0, 0, 1, 1], [], []>} : vector<2x32xf32>, vector<32x128xf32>, vector<2x128xf32> -> vector<2x128xf32>
    %95 = arith.addf %24, %94 : vector<2x128xf32>
    %96 = arith.negf %95 : vector<2x128xf32>
    %97 = math.exp %96 : vector<2x128xf32>
    %cst_29 = arith.constant 1.000000e+00 : f32
    %98 = vector.broadcast %cst_29 : f32 to vector<2x128xf32>
    %99 = arith.addf %98, %97 : vector<2x128xf32>
    %100 = arith.divf %98, %99 : vector<2x128xf32>
    %101 = math.tanh %95 : vector<2x128xf32>
    %102 = vector.extract_strided_slice %100 {offsets = [0, 0], sizes = [2, 32], strides = [1, 1]} : vector<2x128xf32> to vector<2x32xf32>
    %103 = vector.extract_strided_slice %100 {offsets = [0, 32], sizes = [2, 32], strides = [1, 1]} : vector<2x128xf32> to vector<2x32xf32>
    %104 = vector.extract_strided_slice %101 {offsets = [0, 64], sizes = [2, 32], strides = [1, 1]} : vector<2x128xf32> to vector<2x32xf32>
    %105 = vector.extract_strided_slice %100 {offsets = [0, 96], sizes = [2, 32], strides = [1, 1]} : vector<2x128xf32> to vector<2x32xf32>
    %106 = arith.mulf %103, %88 : vector<2x32xf32>
    %107 = arith.mulf %102, %104 : vector<2x32xf32>
    %108 = arith.addf %106, %107 : vector<2x32xf32>
    %109 = math.tanh %108 : vector<2x32xf32>
    %110 = arith.mulf %105, %109 : vector<2x32xf32>
    %c0_30 = arith.constant 0 : index
    %c3 = arith.constant 3 : index
    %c0_31 = arith.constant 0 : index
    %111 = vector.load %arg6[%c0_30, %c3, %c0_31] : memref<2x8x32xf32, #tpu.memory_space<vmem>>, vector<2x1x32xf32>
    %112 = vector.shape_cast %111 : vector<2x1x32xf32> to vector<2x32xf32>
    %113 = vector.shape_cast %110 : vector<2x32xf32> to vector<2x1x32xf32>
    tpu.vector_store %arg6[%c0_30, %c3, %c0_31], %113 {strides = array<i32>} : memref<2x8x32xf32, #tpu.memory_space<vmem>>, vector<2x1x32xf32>,
    %cst_32 = arith.constant dense<0.000000e+00> : vector<2x128xf32>
    %114 = tpu.matmul %110, %1, %cst_32 {dimension_numbers = #tpu.dot_dimension_numbers<[1], [0], [0], [1], [0, 0, 1, 1], [], []>} : vector<2x32xf32>, vector<32x128xf32>, vector<2x128xf32> -> vector<2x128xf32>
    %115 = arith.addf %26, %114 : vector<2x128xf32>
    %116 = arith.negf %115 : vector<2x128xf32>
    %117 = math.exp %116 : vector<2x128xf32>
    %cst_33 = arith.constant 1.000000e+00 : f32
    %118 = vector.broadcast %cst_33 : f32 to vector<2x128xf32>
    %119 = arith.addf %118, %117 : vector<2x128xf32>
    %120 = arith.divf %118, %119 : vector<2x128xf32>
    %121 = math.tanh %115 : vector<2x128xf32>
    %122 = vector.extract_strided_slice %120 {offsets = [0, 0], sizes = [2, 32], strides = [1, 1]} : vector<2x128xf32> to vector<2x32xf32>
    %123 = vector.extract_strided_slice %120 {offsets = [0, 32], sizes = [2, 32], strides = [1, 1]} : vector<2x128xf32> to vector<2x32xf32>
    %124 = vector.extract_strided_slice %121 {offsets = [0, 64], sizes = [2, 32], strides = [1, 1]} : vector<2x128xf32> to vector<2x32xf32>
    %125 = vector.extract_strided_slice %120 {offsets = [0, 96], sizes = [2, 32], strides = [1, 1]} : vector<2x128xf32> to vector<2x32xf32>
    %126 = arith.mulf %123, %108 : vector<2x32xf32>
    %127 = arith.mulf %122, %124 : vector<2x32xf32>
    %128 = arith.addf %126, %127 : vector<2x32xf32>
    %129 = math.tanh %128 : vector<2x32xf32>
    %130 = arith.mulf %125, %129 : vector<2x32xf32>
    %c0_34 = arith.constant 0 : index
    %c4 = arith.constant 4 : index
    %c0_35 = arith.constant 0 : index
    %131 = vector.load %arg6[%c0_34, %c4, %c0_35] : memref<2x8x32xf32, #tpu.memory_space<vmem>>, vector<2x1x32xf32>
    %132 = vector.shape_cast %131 : vector<2x1x32xf32> to vector<2x32xf32>
    %133 = vector.shape_cast %130 : vector<2x32xf32> to vector<2x1x32xf32>
    tpu.vector_store %arg6[%c0_34, %c4, %c0_35], %133 {strides = array<i32>} : memref<2x8x32xf32, #tpu.memory_space<vmem>>, vector<2x1x32xf32>,
    %cst_36 = arith.constant dense<0.000000e+00> : vector<2x128xf32>
    %134 = tpu.matmul %130, %1, %cst_36 {dimension_numbers = #tpu.dot_dimension_numbers<[1], [0], [0], [1], [0, 0, 1, 1], [], []>} : vector<2x32xf32>, vector<32x128xf32>, vector<2x128xf32> -> vector<2x128xf32>
    %135 = arith.addf %28, %134 : vector<2x128xf32>
    %136 = arith.negf %135 : vector<2x128xf32>
    %137 = math.exp %136 : vector<2x128xf32>
    %cst_37 = arith.constant 1.000000e+00 : f32
    %138 = vector.broadcast %cst_37 : f32 to vector<2x128xf32>
    %139 = arith.addf %138, %137 : vector<2x128xf32>
    %140 = arith.divf %138, %139 : vector<2x128xf32>
    %141 = math.tanh %135 : vector<2x128xf32>
    %142 = vector.extract_strided_slice %140 {offsets = [0, 0], sizes = [2, 32], strides = [1, 1]} : vector<2x128xf32> to vector<2x32xf32>
    %143 = vector.extract_strided_slice %140 {offsets = [0, 32], sizes = [2, 32], strides = [1, 1]} : vector<2x128xf32> to vector<2x32xf32>
    %144 = vector.extract_strided_slice %141 {offsets = [0, 64], sizes = [2, 32], strides = [1, 1]} : vector<2x128xf32> to vector<2x32xf32>
    %145 = vector.extract_strided_slice %140 {offsets = [0, 96], sizes = [2, 32], strides = [1, 1]} : vector<2x128xf32> to vector<2x32xf32>
    %146 = arith.mulf %143, %128 : vector<2x32xf32>
    %147 = arith.mulf %142, %144 : vector<2x32xf32>
    %148 = arith.addf %146, %147 : vector<2x32xf32>
    %149 = math.tanh %148 : vector<2x32xf32>
    %150 = arith.mulf %145, %149 : vector<2x32xf32>
    %c0_38 = arith.constant 0 : index
    %c5 = arith.constant 5 : index
    %c0_39 = arith.constant 0 : index
    %151 = vector.load %arg6[%c0_38, %c5, %c0_39] : memref<2x8x32xf32, #tpu.memory_space<vmem>>, vector<2x1x32xf32>
    %152 = vector.shape_cast %151 : vector<2x1x32xf32> to vector<2x32xf32>
    %153 = vector.shape_cast %150 : vector<2x32xf32> to vector<2x1x32xf32>
    tpu.vector_store %arg6[%c0_38, %c5, %c0_39], %153 {strides = array<i32>} : memref<2x8x32xf32, #tpu.memory_space<vmem>>, vector<2x1x32xf32>,
    %cst_40 = arith.constant dense<0.000000e+00> : vector<2x128xf32>
    %154 = tpu.matmul %150, %1, %cst_40 {dimension_numbers = #tpu.dot_dimension_numbers<[1], [0], [0], [1], [0, 0, 1, 1], [], []>} : vector<2x32xf32>, vector<32x128xf32>, vector<2x128xf32> -> vector<2x128xf32>
    %155 = arith.addf %30, %154 : vector<2x128xf32>
    %156 = arith.negf %155 : vector<2x128xf32>
    %157 = math.exp %156 : vector<2x128xf32>
    %cst_41 = arith.constant 1.000000e+00 : f32
    %158 = vector.broadcast %cst_41 : f32 to vector<2x128xf32>
    %159 = arith.addf %158, %157 : vector<2x128xf32>
    %160 = arith.divf %158, %159 : vector<2x128xf32>
    %161 = math.tanh %155 : vector<2x128xf32>
    %162 = vector.extract_strided_slice %160 {offsets = [0, 0], sizes = [2, 32], strides = [1, 1]} : vector<2x128xf32> to vector<2x32xf32>
    %163 = vector.extract_strided_slice %160 {offsets = [0, 32], sizes = [2, 32], strides = [1, 1]} : vector<2x128xf32> to vector<2x32xf32>
    %164 = vector.extract_strided_slice %161 {offsets = [0, 64], sizes = [2, 32], strides = [1, 1]} : vector<2x128xf32> to vector<2x32xf32>
    %165 = vector.extract_strided_slice %160 {offsets = [0, 96], sizes = [2, 32], strides = [1, 1]} : vector<2x128xf32> to vector<2x32xf32>
    %166 = arith.mulf %163, %148 : vector<2x32xf32>
    %167 = arith.mulf %162, %164 : vector<2x32xf32>
    %168 = arith.addf %166, %167 : vector<2x32xf32>
    %169 = math.tanh %168 : vector<2x32xf32>
    %170 = arith.mulf %165, %169 : vector<2x32xf32>
    %c0_42 = arith.constant 0 : index
    %c6 = arith.constant 6 : index
    %c0_43 = arith.constant 0 : index
    %171 = vector.load %arg6[%c0_42, %c6, %c0_43] : memref<2x8x32xf32, #tpu.memory_space<vmem>>, vector<2x1x32xf32>
    %172 = vector.shape_cast %171 : vector<2x1x32xf32> to vector<2x32xf32>
    %173 = vector.shape_cast %170 : vector<2x32xf32> to vector<2x1x32xf32>
    tpu.vector_store %arg6[%c0_42, %c6, %c0_43], %173 {strides = array<i32>} : memref<2x8x32xf32, #tpu.memory_space<vmem>>, vector<2x1x32xf32>,
    %cst_44 = arith.constant dense<0.000000e+00> : vector<2x128xf32>
    %174 = tpu.matmul %170, %1, %cst_44 {dimension_numbers = #tpu.dot_dimension_numbers<[1], [0], [0], [1], [0, 0, 1, 1], [], []>} : vector<2x32xf32>, vector<32x128xf32>, vector<2x128xf32> -> vector<2x128xf32>
    %175 = arith.addf %32, %174 : vector<2x128xf32>
    %176 = arith.negf %175 : vector<2x128xf32>
    %177 = math.exp %176 : vector<2x128xf32>
    %cst_45 = arith.constant 1.000000e+00 : f32
    %178 = vector.broadcast %cst_45 : f32 to vector<2x128xf32>
    %179 = arith.addf %178, %177 : vector<2x128xf32>
    %180 = arith.divf %178, %179 : vector<2x128xf32>
    %181 = math.tanh %175 : vector<2x128xf32>
    %182 = vector.extract_strided_slice %180 {offsets = [0, 0], sizes = [2, 32], strides = [1, 1]} : vector<2x128xf32> to vector<2x32xf32>
    %183 = vector.extract_strided_slice %180 {offsets = [0, 32], sizes = [2, 32], strides = [1, 1]} : vector<2x128xf32> to vector<2x32xf32>
    %184 = vector.extract_strided_slice %181 {offsets = [0, 64], sizes = [2, 32], strides = [1, 1]} : vector<2x128xf32> to vector<2x32xf32>
    %185 = vector.extract_strided_slice %180 {offsets = [0, 96], sizes = [2, 32], strides = [1, 1]} : vector<2x128xf32> to vector<2x32xf32>
    %186 = arith.mulf %183, %168 : vector<2x32xf32>
    %187 = arith.mulf %182, %184 : vector<2x32xf32>
    %188 = arith.addf %186, %187 : vector<2x32xf32>
    %189 = math.tanh %188 : vector<2x32xf32>
    %190 = arith.mulf %185, %189 : vector<2x32xf32>
    %c0_46 = arith.constant 0 : index
    %c7 = arith.constant 7 : index
    %c0_47 = arith.constant 0 : index
    %191 = vector.load %arg6[%c0_46, %c7, %c0_47] : memref<2x8x32xf32, #tpu.memory_space<vmem>>, vector<2x1x32xf32>
    %192 = vector.shape_cast %191 : vector<2x1x32xf32> to vector<2x32xf32>
    %193 = vector.shape_cast %190 : vector<2x32xf32> to vector<2x1x32xf32>
    tpu.vector_store %arg6[%c0_46, %c7, %c0_47], %193 {strides = array<i32>} : memref<2x8x32xf32, #tpu.memory_space<vmem>>, vector<2x1x32xf32>,
    %c0_48 = arith.constant 0 : index
    %c0_49 = arith.constant 0 : index
    %c0_50 = arith.constant 0 : index
    %194 = vector.load %arg6[%c0_48, %c0_49, %c0_50] : memref<2x8x32xf32, #tpu.memory_space<vmem>>, vector<2x8x32xf32>
    %195 = vector.shape_cast %194 : vector<2x8x32xf32> to vector<16x32xf32>
    %cst_51 = arith.constant dense<0.000000e+00> : vector<16x24xf32>
    %196 = tpu.matmul %195, %3, %cst_51 {dimension_numbers = #tpu.dot_dimension_numbers<[1], [0], [0], [1], [0, 0, 1, 1], [], []>} : vector<16x32xf32>, vector<32x24xf32>, vector<16x24xf32> -> vector<16x24xf32>
    %197 = vector.broadcast %6 : vector<1x24xf32> to vector<16x24xf32>
    %198 = arith.addf %196, %197 : vector<16x24xf32>
    %199 = vector.shape_cast %198 : vector<16x24xf32> to vector<2x8x24xf32>
    %cst_52 = arith.constant dense<0xFF800000> : vector<2x8xf32>
    %200 = vector.multi_reduction <maximumf>, %199, %cst_52 [2] : vector<2x8x24xf32> to vector<2x8xf32>
    %201 = vector.shape_cast %200 : vector<2x8xf32> to vector<2x8x1xf32>
    %202 = tpu.iota {dimensions = array<i32: 2>} : vector<2x8x24xi32>
    %203 = vector.broadcast %201 : vector<2x8x1xf32> to vector<2x8x24xf32>
    %204 = arith.cmpf oeq, %199, %203 : vector<2x8x24xf32>
    %c24_i32 = arith.constant 24 : i32
    %205 = vector.broadcast %c24_i32 : i32 to vector<2x8x24xi32>
    %206 = arith.select %204, %202, %205 : vector<2x8x24xi1>, vector<2x8x24xi32>
    %cst_53 = arith.constant dense<2147483647> : vector<2x8xi32>
    %207 = vector.multi_reduction <minsi>, %206, %cst_53 [2] : vector<2x8x24xi32> to vector<2x8xi32>
    %208 = vector.shape_cast %207 : vector<2x8xi32> to vector<2x8x1xi32>
    %c0_54 = arith.constant 0 : index
    %c0_55 = arith.constant 0 : index
    %c0_56 = arith.constant 0 : index
    %209 = vector.load %arg5[%c0_54, %c0_55, %c0_56] : memref<2x8x1xi32, #tpu.memory_space<vmem>>, vector<2x8x1xi32>
    tpu.vector_store %arg5[%c0_54, %c0_55, %c0_56], %208 {strides = array<i32>} : memref<2x8x1xi32, #tpu.memory_space<vmem>>, vector<2x8x1xi32>,
    %210 = vector.broadcast %201 : vector<2x8x1xf32> to vector<2x8x24xf32>
    %211 = arith.subf %199, %210 : vector<2x8x24xf32>
    %212 = math.exp %211 : vector<2x8x24xf32>
    %cst_57 = arith.constant dense<0.000000e+00> : vector<2x8xf32>
    %213 = vector.multi_reduction <add>, %212, %cst_57 [2] : vector<2x8x24xf32> to vector<2x8xf32>
    %214 = vector.shape_cast %213 : vector<2x8xf32> to vector<2x8x1xf32>
    %215 = math.log %214 : vector<2x8x1xf32>
    %216 = vector.broadcast %215 : vector<2x8x1xf32> to vector<2x8x24xf32>
    %217 = arith.subf %211, %216 : vector<2x8x24xf32>
    %c0_58 = arith.constant 0 : index
    %c0_59 = arith.constant 0 : index
    %c0_60 = arith.constant 0 : index
    %218 = vector.load %arg4[%c0_58, %c0_59, %c0_60] : memref<2x8x24xf32, #tpu.memory_space<vmem>>, vector<2x8x24xf32>
    tpu.vector_store %arg4[%c0_58, %c0_59, %c0_60], %217 {strides = array<i32>} : memref<2x8x24xf32, #tpu.memory_space<vmem>>, vector<2x8x24xf32>,
    return
  }
}

</mosaic_0001>

<bundles_post_ra>
// kernel: lm_deep_forward.1
= control target key start
LH: loop header
LB: loop body
LE: loop exit
PB: predicated region body
PF: predicated region fallthrough
CT: control target
= control target key end

     0   :  { %11 = vsyncpa [#allocation4], 0  ;;  %s1930_s0 = inlined_call_operand.hbm [shape: f32[2,8,24], index: 0, kind: input, shape index: {}]   ;;  %s1931_s1 = inlined_call_operand.hbm [shape: f32[2,8], index: 1, kind: input, shape index: {}]   ;;  %s1932_s2 = inlined_call_operand.hbm [shape: f32[96,128], index: 2, kind: input, shape index: {}]   ;;  %s1933_s3 = inlined_call_operand.hbm [shape: f32[1,384], index: 3, kind: input, shape index: {}]   ;;  %s1934_s4 = inlined_call_operand.hbm [shape: f32[2,8,24], index: 4, kind: output, shape index: {0}]   ;;  %s1935_s5 = inlined_call_operand.vmem [shape: s32[2,8,1], index: 5, kind: output, shape index: {1}]  }
   0x1   :  { %12 = vsyncpa [#allocation7], 0 }
   0x2   :  { %13 = vsyncpa [#allocation10], 0  ;;  %s33_s20 = sshll.u32 %s1931_s1, 4  ;;  %s34_s20 = int_to_ptr.hbm [resolvable:$true] %s33_s20 }
   0x3   :  { %14 = vsyncpa [#allocation5], 0  ;;  %s1574_s21 = smov [#allocation6]   ;;  %s19_s25 = sshll.u32 %s1930_s0, 4  ;;  %s20_s25 = int_to_ptr.hbm [resolvable:$true] %s19_s25 }
   0x4   :  { %s35_s22 = sshll.u32 %s1574_s21, 4  ;;  %s1575_s26 = smov [#allocation3]   ;;  %s36_s22 = int_to_ptr.vmem [resolvable:$true] %s35_s22 }
   0x5   :  { %38 = dma.hbm_to_vmem [thread:$0]  %s34_s20, 32, %s36_s22, [#allocation7]  }
   0x6   :  { %s21_s27 = sshll.u32 %s1575_s26, 4  ;;  %s1576_s28 = smov 128   ;;  %s22_s27 = int_to_ptr.vmem [resolvable:$true] %s21_s27 }
   0x7   :  { %s1577_s29 = smov 8   ;;  %s43_s6 = sshll.u32 %s1932_s2, 4  ;;  %s44_s6 = int_to_ptr.hbm [resolvable:$true] %s43_s6 }
   0x8   :  { %27 = dma.hbm_to_vmem [thread:$0]  %s20_s25, 256, %s22_s27, [#allocation4], %s1576_s28, %s1576_s28, %s1577_s29  }
   0x9   :  { %s1578_s7 = smov [#allocation8]   ;;  %s57_s10 = sshll.u32 %s1933_s3, 4  ;;  %s58_s10 = int_to_ptr.hbm [resolvable:$true] %s57_s10 }
   0xa   :  { %s45_s8 = sshll.u32 %s1578_s7, 4  ;;  %s1579_s11 = smov [#allocation9]   ;;  %s46_s8 = int_to_ptr.vmem [resolvable:$true] %s45_s8 }
   0xb   :  { %51 = dma.hbm_to_vmem [thread:$0]  %s44_s6, 1536, %s46_s8, [#allocation7], %s1576_s28, %s1576_s28, %s1577_s29  }
   0xc   :  { %s59_s12 = sshll.u32 %s1579_s11, 4  ;;  %s60_s12 = int_to_ptr.vmem [resolvable:$true] %s59_s12 }
   0xd   :  { %62 = dma.hbm_to_vmem [thread:$0]  %s58_s10, 48, %s60_s12, [#allocation10]  }
   0xe   :  { %1566 = dma.done.wait [#allocation4], 256  }
   0xf   :  { %1567 = vsyncadd [#allocation4], 4294967040 }
  0x10   :  { %1568 = dma.done.wait [#allocation7], 1568  }
  0x11   :  { %1569 = vsyncadd [#allocation7], 4294965728 }
  0x12   :  { %1570 = dma.done.wait [#allocation10], 48  }
  0x13   :  { %1571 = vsyncadd [#allocation10], 4294967248  ;;  %vm98_vm0 = vcmask 64512   ;;  %v86_v0 = vld [vmem:[#allocation8 + $0x38] sm:$0xff]  ;;  %v81_v2 = vld [vmem:[#allocation8 + $0x10] sm:$0xff]  ;;  %vm127_vm1 = vcmask 195584  }
  0x14   :  { %v94_v1 = vld [vmem:[#allocation6] sm:$0x3]  ;;  %117 = vmatpush.msra.mxu0 %v86_v0  ;;  %147 = vmatpush.msra.mxu1 %v81_v2  ;;  %v1631_v3 = vld [vmem:[#allocation8 + $0x30] sm:$0xff]  ;;  %v80_v4 = vld [vmem:[#allocation8 + $0x8] sm:$0xff]  ;;  %vm157_vm2 = vcmask 261120   ;;  %s1580_s2 = smov 64  }
  0x15   :  { %v1633_v5 = vld [vmem:[#allocation8 + $0x28] sm:$0xff]  ;;  %1269 = vmatmul.msk.f32.vlgmr.msra.gmra.mxu0 %vm98_vm0, %v94_v1  ;;  %173 = vmatpush.msra.mxu2 %v1631_v3  ;;  %v79_v6 = vld [vmem:[#allocation8] sm:$0xff]  ;;  %v1645_v9 = vld [vmem:[#allocation8 + $0x18] sm:$0xff]  ;;  %s1581_s3 = smov 32   ;;  %vm273_vm11 = vcmask 1041409   ;;  %s1582_s13 = smov [#allocation11]  }
  0x16   :  { %148 = vmatpush.msra.mxu1 %v80_v4  ;;  %291 = vmatpush.msrb.mxu0 %v1631_v3  ;;  %v1641_v7 = vld [vmem:[#allocation8 + $0x20] sm:$0xff]  ;;  %v122_v8 = vld [vmem:[#allocation3] sm:$0xff]  ;;  %v123_v10 = vld [vmem:[#allocation3 + $0x8] sm:$0xff]  ;;  %s1248_s14 = sshll.u32 %s1582_s13, 4  ;;  %s1250_s17 = sshll.u32 %s1934_s4, 4  ;;  %s1249_s14 = int_to_ptr.vmem [resolvable:$true] %s1248_s14  ;;  %s1251_s17 = int_to_ptr.hbm [resolvable:$true] %s1250_s17 }
  0x17   :  { %174 = vmatpush.msra.mxu2 %v1633_v5  ;;  %664 = vmatpush.msra.mxu3 %v1631_v3  ;;  %v1307_v11 = vld [vmem:[#allocation9] ss:$0 sm:$0xff]  ;;  %v1308_v16 = vld [vmem:[#allocation9 + $0x1] ss:$0 sm:$0xff] }
  0x18   :  { %292 = vmatpush.msrb.mxu0 %v1633_v5  ;;  %149 = vmatpush.msra.mxu1 %v79_v6 }
  0x19   :  { %665 = vmatpush.msra.mxu3 %v1633_v5  ;;  %175 = vmatpush.msra.mxu2 %v1641_v7 }
  0x1a   :  { %1270 = vmatmul.msk.f32.vlgmr.msra.gmra.mxu1 %vm127_vm1, %v122_v8  ;;  %293 = vmatpush.msrb.mxu0 %v1641_v7 }
  0x1b   :  { %176 = vmatpush.msra.mxu2 %v1645_v9  ;;  %666 = vmatpush.msra.mxu3 %v1641_v7 }
  0x1c   :  { %294 = vmatpush.msrb.mxu0 %v1645_v9  ;;  %914 = vmatpush.msrb.mxu1 %v1631_v3 }
  0x1d   :  { %539 = vmatpush.msrb.mxu2 %v1631_v3  ;;  %667 = vmatpush.msra.mxu3 %v1645_v9 }
  0x1e   :  { %414 = vmatpush.msra.mxu0 %v1631_v3  ;;  %915 = vmatpush.msrb.mxu1 %v1633_v5 }
  0x1f   :  { %540 = vmatpush.msrb.mxu2 %v1633_v5 }
  0x20   :  { %415 = vmatpush.msra.mxu0 %v1633_v5  ;;  %916 = vmatpush.msrb.mxu1 %v1641_v7 }
  0x21   :  { %541 = vmatpush.msrb.mxu2 %v1641_v7 }
  0x22   :  { %416 = vmatpush.msra.mxu0 %v1641_v7  ;;  %1271 = vmatmul.msk.f32.gmra.mxu1 %vm127_vm1, %v123_v10 }
  0x23   :  { %542 = vmatpush.msrb.mxu2 %v1645_v9  ;;  %917 = vmatpush.msrb.mxu1 %v1645_v9 }
  0x24   :  { %417 = vmatpush.msra.mxu0 %v1645_v9 }
  0x92   :  { %v119_v12 = vpop.f32.mrf.mxu0 }
  0x93   :  { %v120_v13 = vadd.f32 %v1307_v11, %v119_v12 }
  0x95   :  { %1272 = vmatmul.msk.f32.vlgmr.msra.gmra.mxu2 %vm157_vm2, %v120_v13 }
  0x96   :  { %1039 = vmatpush.msra.mxu2 %v1631_v3 }
  0x97   :  { %v151_v14 = vpop.f32.mrf.mxu1 }
  0x98   :  { %1040 = vmatpush.msra.mxu2 %v1633_v5  ;;  %v1673_v21 = vadd.f32 %v1308_v16, %v151_v14 }
  0x9a   :  { %1041 = vmatpush.msra.mxu2 %v1641_v7 }
  0x9c   :  { %1042 = vmatpush.msra.mxu2 %v1645_v9 }
  0x9f   :  { %v154_v15 = vpop.f32.mrf.mxu1 }
  0xa0   :  { %v1670_v17 = vadd.f32 %v1308_v16, %v154_v15 }
 0x118   :  { %v178_v18 = vpop.f32.mrf.mxu2 }
 0x119   :  { %v182_v19 = vrot.slane %v178_v18, 1  ;;  %v185_v22 = vadd.f32 %v178_v18, %v1673_v21 }
 0x11b   :  { %v186_v20 = vadd.f32 %v182_v19, %v1670_v17  ;;  %v1273_v26 = vmul.f32 -1.442695, %v185_v22 }
 0x11d   :  { %1310 = vtanh.f32 %v186_v20  ;;  %v1274_v25 = vmul.f32 -1.442695, %v186_v20 }
 0x11e   :  { %1312 = vtanh.f32 %v185_v22 }
 0x11f   :  { %1314 = vpow2.f32 %v1274_v25 }
 0x120   :  { %1316 = vpow2.f32 %v1273_v26 }
 0x123   :  { %v1311_v23 = vpop.eup %1310 }
 0x124   :  { %233 = vrot.lane.b32.xlu0 %v1311_v23, %s1580_s2  ;;  %v1313_v24 = vpop.eup %1312 }
 0x125   :  { %v1315_v27 = vpop.eup %1314 }
 0x126   :  { %v194_v28 = vadd.f32 1.0, %v1315_v27  ;;  %v1317_v29 = vpop.eup %1316 }
 0x127   :  { %v193_v30 = vadd.f32 1.0, %v1317_v29 }
 0x128   :  { %1318 = vrcp.f32 %v194_v28  ;;  %v221_v39 = vand.u32 2147483648, %v194_v28  ;;  %vm215_vm4 = vweird.f32 %v194_v28  ;;  %v219_v40 = vand.u32 2147483647, %v194_v28 }
 0x129   :  { %1320 = vrcp.f32 %v193_v30  ;;  %v206_v48 = vand.u32 2147483648, %v193_v30  ;;  %vm200_vm8 = vweird.f32 %v193_v30  ;;  %v204_v49 = vand.u32 2147483647, %v193_v30 }
 0x12a   :  { %v222_v43 = vor.u32 1.1754944e-38, %v221_v39  ;;  %vm220_vm6 = vcmp.eq.f32.partialorder %v219_v40, 8.507059e+37 }
 0x12b   :  { %v207_v51 = vor.u32 1.1754944e-38, %v206_v48  ;;  %vm205_vm10 = vcmp.eq.f32.partialorder %v204_v49, 8.507059e+37 }
 0x12c   :  { %231 = vrot.lane.b32.xlu0 %v1313_v24, %s1580_s2 }
 0x12e   :  { %v1319_v31 = vpop.eup %1318 }
 0x12f   :  { %v211_v32 = vmul.f32 %v1319_v31, %v194_v28  ;;  %v1321_v34 = vpop.eup %1320  ;;  %vm216_vm3 = vweird.f32 %v1319_v31 }
 0x130   :  { %v196_v36 = vmul.f32 %v1321_v34, %v193_v30  ;;  %vm217_vm5 = vmor %vm215_vm4, %vm216_vm3  ;;  %vm201_vm7 = vweird.f32 %v1321_v34 }
 0x131   :  { %v212_v33 = vsub.f32 1.0, %v211_v32  ;;  %vm202_vm9 = vmor %vm200_vm8, %vm201_vm7 }
 0x132   :  { %v197_v38 = vsub.f32 1.0, %v196_v36 }
 0x133   :  { %v213_v35 = vmul.f32 %v1319_v31, %v212_v33 }
 0x134   :  { %v198_v42 = vmul.f32 %v1321_v34, %v197_v38 }
 0x135   :  { %v214_v37 = vadd.f32 %v1319_v31, %v213_v35 }
 0x136   :  { %v199_v47 = vadd.f32 %v1321_v34, %v198_v42 }
 0x137   :  { %v218_v41 = vsel %vm217_vm5, %v1319_v31, %v214_v37 }
 0x138   :  { %v223_v45 = vsel %vm220_vm6, %v222_v43, %v218_v41  ;;  %v203_v50 = vsel %vm202_vm9, %v1321_v34, %v199_v47 }
 0x139   :  { %v208_v53 = vsel %vm205_vm10, %v207_v51, %v203_v50  ;;  %v228_v55 = vmul.f32 0.0, %v223_v45 }
 0x13a   :  { %v227_v58 = vmul.f32 0.0, %v208_v53 }
 0x196   :  { %v234_v44 = vpop.permute.xlu0 %233 }
 0x197   :  { %v238_v46 = vmul.f32 %v234_v44, %v223_v45 }
 0x199   :  { %243 = vrot.lane.b32.xlu1 %v238_v46, %s1581_s3 }
 0x19e   :  { %v232_v52 = vpop.permute.xlu0 %231 }
 0x19f   :  { %v237_v54 = vmul.f32 %v232_v52, %v208_v53 }
 0x1a1   :  { %241 = vrot.lane.b32.xlu1 %v237_v54, %s1581_s3 }
 0x20b   :  { %v244_v56 = vpop.permute.xlu1 %243 }
 0x20c   :  { %v1680_v57 = vadd.f32 %v244_v56, %v228_v55 }
 0x20e   :  { %1322 = vtanh.f32 %v1680_v57  ;;  %v348_v44 = vrot.slane %v1680_v57, 7 }
 0x213   :  { %v242_v59 = vpop.permute.xlu1 %241 }
 0x214   :  { %v1323_v60 = vpop.eup %1322  ;;  %v1683_v61 = vadd.f32 %v242_v59, %v227_v58 }
 0x215   :  { %255 = vrot.lane.b32.xlu2 %v1323_v60, %s1580_s2 }
 0x216   :  { %1324 = vtanh.f32 %v1683_v61  ;;  %v347_v49 = vrot.slane %v1683_v61, 7 }
 0x21c   :  { %v1325_v62 = vpop.eup %1324 }
 0x21d   :  { %253 = vrot.lane.b32.xlu2 %v1325_v62, %s1580_s2 }
 0x26f   :  { %v256_v63 = vpop.permute.xlu2 %255 }
 0x270   :  { %v1688_v0 = vmul.f32 %v256_v63, %v223_v45 }
 0x272   :  { %v272_v2 = vrot.slane %v1688_v0, 7 }
 0x277   :  { %v254_v1 = vpop.permute.xlu2 %253 }
 0x278   :  { %v1691_v4 = vmul.f32 %v254_v1, %v208_v53 }
 0x27a   :  { %v274_v6 = vsel %vm273_vm11, %v272_v2, %v1691_v4 }
 0x27b   :  { %275 = vrot.lane.b32.xlu0 %v274_v6, %s1581_s3 }
 0x2ed   :  { %v276_v8 = vpop.permute.xlu0 %275 }
 0x2ee   :  { %1275 = vmatmul.msk.f32.vlgmr.msrb.gmra.mxu0 %vm157_vm2, %v276_v8 }
 0x2ef   :  { %789 = vmatpush.msrb.mxu0 %v1631_v3 }
 0x2f1   :  { %790 = vmatpush.msrb.mxu0 %v1633_v5 }
 0x2f3   :  { %791 = vmatpush.msrb.mxu0 %v1641_v7 }
 0x2f5   :  { %792 = vmatpush.msrb.mxu0 %v1645_v9 }
 0x36b   :  { %v296_v10 = vpop.f32.mrf.mxu0 }
 0x36c   :  { %v300_v11 = vrot.slane %v296_v10, 7  ;;  %v304_v12 = vadd.f32 %v296_v10, %v1670_v17 }
 0x36e   :  { %v303_v13 = vadd.f32 %v300_v11, %v1673_v21  ;;  %1326 = vtanh.f32 %v304_v12  ;;  %v1277_v3 = vmul.f32 -1.442695, %v304_v12 }
 0x370   :  { %1328 = vtanh.f32 %v303_v13  ;;  %v1276_v18 = vmul.f32 -1.442695, %v303_v13 }
 0x371   :  { %1330 = vpow2.f32 %v1277_v3 }
 0x374   :  { %v1327_v14 = vpop.eup %1326 }
 0x375   :  { %357 = vrot.lane.b32.xlu2 %v1327_v14, %s1580_s2 }
 0x376   :  { %v1329_v15 = vpop.eup %1328 }
 0x377   :  { %355 = vrot.lane.b32.xlu1 %v1329_v15, %s1580_s2  ;;  %v1331_v5 = vpop.eup %1330 }
 0x378   :  { %v312_v7 = vadd.f32 1.0, %v1331_v5 }
 0x37a   :  { %1332 = vrcp.f32 %v312_v7  ;;  %v339_v24 = vand.u32 2147483648, %v312_v7  ;;  %vm333_vm13 = vweird.f32 %v312_v7  ;;  %v337_v26 = vand.u32 2147483647, %v312_v7 }
 0x37b   :  { %1334 = vpow2.f32 %v1276_v18 }
 0x37c   :  { %v340_v28 = vor.u32 1.1754944e-38, %v339_v24  ;;  %vm338_vm15 = vcmp.eq.f32.partialorder %v337_v26, 8.507059e+37 }
 0x380   :  { %v1333_v9 = vpop.eup %1332 }
 0x381   :  { %v329_v16 = vmul.f32 %v1333_v9, %v312_v7  ;;  %v1335_v22 = vpop.eup %1334  ;;  %vm334_vm12 = vweird.f32 %v1333_v9 }
 0x382   :  { %v311_v25 = vadd.f32 1.0, %v1335_v22  ;;  %vm335_vm14 = vmor %vm333_vm13, %vm334_vm12 }
 0x383   :  { %v330_v19 = vsub.f32 1.0, %v329_v16 }
 0x384   :  { %1336 = vrcp.f32 %v311_v25  ;;  %v324_v37 = vand.u32 2147483648, %v311_v25  ;;  %vm318_vm3 = vweird.f32 %v311_v25  ;;  %v322_v38 = vand.u32 2147483647, %v311_v25 }
 0x385   :  { %v331_v20 = vmul.f32 %v1333_v9, %v330_v19 }
 0x386   :  { %v325_v40 = vor.u32 1.1754944e-38, %v324_v37  ;;  %vm323_vm5 = vcmp.eq.f32.partialorder %v322_v38, 8.507059e+37 }
 0x387   :  { %v332_v23 = vadd.f32 %v1333_v9, %v331_v20 }
 0x389   :  { %v336_v27 = vsel %vm335_vm14, %v1333_v9, %v332_v23 }
 0x38a   :  { %v341_v30 = vsel %vm338_vm15, %v340_v28, %v336_v27  ;;  %v1337_v32 = vpop.eup %1336 }
 0x38b   :  { %v314_v33 = vmul.f32 %v1337_v32, %v311_v25  ;;  %vm319_vm0 = vweird.f32 %v1337_v32  ;;  %v352_v45 = vmul.f32 %v348_v44, %v341_v30 }
 0x38c   :  { %vm320_vm4 = vmor %vm318_vm3, %vm319_vm0 }
 0x38d   :  { %v315_v34 = vsub.f32 1.0, %v314_v33 }
 0x38f   :  { %v316_v35 = vmul.f32 %v1337_v32, %v315_v34 }
 0x391   :  { %v317_v36 = vadd.f32 %v1337_v32, %v316_v35 }
 0x393   :  { %v321_v39 = vsel %vm320_vm4, %v1337_v32, %v317_v36 }
 0x394   :  { %v326_v42 = vsel %vm323_vm5, %v325_v40, %v321_v39 }
 0x395   :  { %v351_v50 = vmul.f32 %v347_v49, %v326_v42 }
 0x3cf   :  { %v358_v29 = vpop.permute.xlu2 %357 }
 0x3d0   :  { %v362_v31 = vmul.f32 %v358_v29, %v341_v30 }
 0x3d2   :  { %367 = vrot.lane.b32.xlu1 %v362_v31, %s1581_s3 }
 0x3e9   :  { %v356_v41 = vpop.permute.xlu1 %355 }
 0x3ea   :  { %v361_v43 = vmul.f32 %v356_v41, %v326_v42 }
 0x3ec   :  { %365 = vrot.lane.b32.xlu0 %v361_v43, %s1581_s3 }
 0x444   :  { %v368_v46 = vpop.permute.xlu1 %367 }
 0x445   :  { %v1708_v47 = vadd.f32 %v368_v46, %v352_v45 }
 0x447   :  { %1338 = vtanh.f32 %v1708_v47  ;;  %v472_v39 = vrot.slane %v1708_v47, 7 }
 0x44d   :  { %v1339_v48 = vpop.eup %1338 }
 0x44e   :  { %379 = vrot.lane.b32.xlu0 %v1339_v48, %s1580_s2 }
 0x45e   :  { %v366_v51 = vpop.permute.xlu0 %365 }
 0x45f   :  { %v1713_v52 = vadd.f32 %v366_v51, %v351_v50 }
 0x461   :  { %1340 = vtanh.f32 %v1713_v52  ;;  %v471_v38 = vrot.slane %v1713_v52, 7 }
 0x467   :  { %v1341_v53 = vpop.eup %1340 }
 0x468   :  { %377 = vrot.lane.b32.xlu2 %v1341_v53, %s1580_s2 }
 0x4c0   :  { %v380_v54 = vpop.permute.xlu0 %379 }
 0x4c1   :  { %v1719_v57 = vmul.f32 %v380_v54, %v341_v30 }
 0x4c2   :  { %v378_v55 = vpop.permute.xlu2 %377 }
 0x4c3   :  { %v1717_v56 = vmul.f32 %v378_v55, %v326_v42 }
 0x4c5   :  { %v396_v58 = vrot.slane %v1717_v56, 1 }
 0x4c7   :  { %v397_v59 = vsel %vm273_vm11, %v1719_v57, %v396_v58 }
 0x4c8   :  { %398 = vrot.lane.b32.xlu1 %v397_v59, %s1581_s3 }
 0x53a   :  { %v399_v60 = vpop.permute.xlu1 %398 }
 0x53b   :  { %1278 = vmatmul.msk.f32.vlgmr.msra.gmra.mxu0 %vm157_vm2, %v399_v60 }
 0x5b8   :  { %v419_v61 = vpop.f32.mrf.mxu0 }
 0x5b9   :  { %v423_v62 = vrot.slane %v419_v61, 6  ;;  %v424_v63 = vrot.slane %v419_v61, 7 }
 0x5bb   :  { %v427_v1 = vadd.f32 %v423_v62, %v1673_v21  ;;  %v428_v2 = vadd.f32 %v424_v63, %v1670_v17 }
 0x5bd   :  { %1342 = vtanh.f32 %v427_v1  ;;  %v1279_v10 = vmul.f32 -1.442695, %v427_v1  ;;  %v1280_v14 = vmul.f32 -1.442695, %v428_v2 }
 0x5be   :  { %1344 = vtanh.f32 %v428_v2 }
 0x5bf   :  { %1346 = vpow2.f32 %v1279_v10 }
 0x5c3   :  { %v1343_v6 = vpop.eup %1342 }
 0x5c4   :  { %v1345_v8 = vpop.eup %1344  ;;  %479 = vrot.lane.b32.xlu2 %v1343_v6, %s1580_s2 }
 0x5c5   :  { %481 = vrot.lane.b32.xlu0 %v1345_v8, %s1580_s2  ;;  %v1347_v11 = vpop.eup %1346 }
 0x5c6   :  { %v435_v12 = vadd.f32 1.0, %v1347_v11 }
 0x5c8   :  { %1348 = vrcp.f32 %v435_v12  ;;  %v448_v18 = vand.u32 2147483648, %v435_v12  ;;  %vm442_vm7 = vweird.f32 %v435_v12  ;;  %v446_v19 = vand.u32 2147483647, %v435_v12 }
 0x5c9   :  { %1350 = vpow2.f32 %v1280_v14 }
 0x5ca   :  { %v449_v22 = vor.u32 1.1754944e-38, %v448_v18  ;;  %vm447_vm9 = vcmp.eq.f32.partialorder %v446_v19, 8.507059e+37 }
 0x5ce   :  { %v1349_v13 = vpop.eup %1348 }
 0x5cf   :  { %v438_v15 = vmul.f32 %v1349_v13, %v435_v12  ;;  %v1351_v7 = vpop.eup %1350  ;;  %vm443_vm6 = vweird.f32 %v1349_v13 }
 0x5d0   :  { %v436_v9 = vadd.f32 1.0, %v1351_v7  ;;  %vm444_vm8 = vmor %vm442_vm7, %vm443_vm6 }
 0x5d1   :  { %v439_v3 = vsub.f32 1.0, %v438_v15 }
 0x5d2   :  { %1352 = vrcp.f32 %v436_v9  ;;  %v463_v31 = vand.u32 2147483648, %v436_v9  ;;  %vm457_vm12 = vweird.f32 %v436_v9  ;;  %v461_v32 = vand.u32 2147483647, %v436_v9 }
 0x5d3   :  { %v440_v5 = vmul.f32 %v1349_v13, %v439_v3 }
 0x5d4   :  { %v464_v34 = vor.u32 1.1754944e-38, %v463_v31  ;;  %vm462_vm14 = vcmp.eq.f32.partialorder %v461_v32, 8.507059e+37 }
 0x5d5   :  { %v441_v16 = vadd.f32 %v1349_v13, %v440_v5 }
 0x5d7   :  { %v445_v20 = vsel %vm444_vm8, %v1349_v13, %v441_v16 }
 0x5d8   :  { %v450_v24 = vsel %vm447_vm9, %v449_v22, %v445_v20  ;;  %v1353_v26 = vpop.eup %1352 }
 0x5d9   :  { %v453_v27 = vmul.f32 %v1353_v26, %v436_v9  ;;  %vm458_vm10 = vweird.f32 %v1353_v26  ;;  %v475_v40 = vmul.f32 %v471_v38, %v450_v24 }
 0x5da   :  { %vm459_vm13 = vmor %vm457_vm12, %vm458_vm10 }
 0x5db   :  { %v454_v28 = vsub.f32 1.0, %v453_v27 }
 0x5dd   :  { %v455_v29 = vmul.f32 %v1353_v26, %v454_v28 }
 0x5df   :  { %v456_v30 = vadd.f32 %v1353_v26, %v455_v29 }
 0x5e1   :  { %v460_v33 = vsel %vm459_vm13, %v1353_v26, %v456_v30 }
 0x5e2   :  { %v465_v36 = vsel %vm462_vm14, %v464_v34, %v460_v33 }
 0x5e3   :  { %v476_v41 = vmul.f32 %v472_v39, %v465_v36 }
 0x61e   :  { %v480_v23 = vpop.permute.xlu2 %479 }
 0x61f   :  { %v485_v25 = vmul.f32 %v480_v23, %v450_v24 }
 0x621   :  { %489 = vrot.lane.b32.xlu1 %v485_v25, %s1581_s3 }
 0x637   :  { %v482_v35 = vpop.permute.xlu0 %481 }
 0x638   :  { %v486_v37 = vmul.f32 %v482_v35, %v465_v36 }
 0x63a   :  { %491 = vrot.lane.b32.xlu2 %v486_v37, %s1581_s3 }
 0x693   :  { %v490_v42 = vpop.permute.xlu1 %489 }
 0x694   :  { %v492_v43 = vpop.permute.xlu2 %491  ;;  %v1734_v44 = vadd.f32 %v490_v42, %v475_v40 }
 0x695   :  { %v1736_v45 = vadd.f32 %v492_v43, %v476_v41 }
 0x696   :  { %1354 = vtanh.f32 %v1734_v44  ;;  %v596_v35 = vrot.slane %v1734_v44, 7 }
 0x697   :  { %1356 = vtanh.f32 %v1736_v45  ;;  %v597_v40 = vrot.slane %v1736_v45, 7 }
 0x69c   :  { %v1355_v46 = vpop.eup %1354 }
 0x69d   :  { %v1357_v48 = vpop.eup %1356  ;;  %501 = vrot.lane.b32.xlu0 %v1355_v46, %s1580_s2 }
 0x69e   :  { %503 = vrot.lane.b32.xlu1 %v1357_v48, %s1580_s2 }
 0x70f   :  { %v502_v49 = vpop.permute.xlu0 %501 }
 0x710   :  { %v504_v47 = vpop.permute.xlu1 %503  ;;  %v1742_v50 = vmul.f32 %v502_v49, %v450_v24 }
 0x711   :  { %v1744_v51 = vmul.f32 %v504_v47, %v465_v36 }
 0x712   :  { %v520_v52 = vrot.slane %v1742_v50, 2 }
 0x713   :  { %v521_v53 = vrot.slane %v1744_v51, 1 }
 0x715   :  { %v522_v54 = vsel %vm273_vm11, %v521_v53, %v520_v52 }
 0x716   :  { %523 = vrot.lane.b32.xlu2 %v522_v54, %s1581_s3 }
 0x770   :  { %v524_v55 = vpop.permute.xlu2 %523 }
 0x771   :  { %1281 = vmatmul.msk.f32.vlgmr.msrb.gmra.mxu2 %vm157_vm2, %v524_v55 }
 0x7f4   :  { %v544_v58 = vpop.f32.mrf.mxu2 }
 0x7f5   :  { %v548_v59 = vrot.slane %v544_v58, 5  ;;  %v549_v60 = vrot.slane %v544_v58, 6 }
 0x7f7   :  { %v552_v61 = vadd.f32 %v548_v59, %v1673_v21  ;;  %v553_v62 = vadd.f32 %v549_v60, %v1670_v17 }
 0x7f9   :  { %1358 = vtanh.f32 %v552_v61  ;;  %v1282_v2 = vmul.f32 -1.442695, %v552_v61  ;;  %v1283_v6 = vmul.f32 -1.442695, %v553_v62 }
 0x7fa   :  { %1360 = vtanh.f32 %v553_v62 }
 0x7fb   :  { %1362 = vpow2.f32 %v1282_v2 }
 0x7fc   :  { %1364 = vpow2.f32 %v1283_v6 }
 0x7ff   :  { %v1359_v63 = vpop.eup %1358 }
 0x800   :  { %v1361_v1 = vpop.eup %1360  ;;  %604 = vrot.lane.b32.xlu0 %v1359_v63, %s1580_s2 }
 0x801   :  { %606 = vrot.lane.b32.xlu1 %v1361_v1, %s1580_s2  ;;  %v1363_v8 = vpop.eup %1362 }
 0x802   :  { %v1365_v10 = vpop.eup %1364  ;;  %v560_v11 = vadd.f32 1.0, %v1363_v8 }
 0x803   :  { %v561_v12 = vadd.f32 1.0, %v1365_v10 }
 0x804   :  { %1366 = vrcp.f32 %v560_v11  ;;  %v573_v20 = vand.u32 2147483648, %v560_v11  ;;  %vm567_vm3 = vweird.f32 %v560_v11  ;;  %v571_v23 = vand.u32 2147483647, %v560_v11 }
 0x805   :  { %1368 = vrcp.f32 %v561_v12  ;;  %v588_v22 = vand.u32 2147483648, %v561_v12  ;;  %vm582_vm4 = vweird.f32 %v561_v12  ;;  %v586_v24 = vand.u32 2147483647, %v561_v12 }
 0x806   :  { %v574_v27 = vor.u32 1.1754944e-38, %v573_v20  ;;  %vm572_vm7 = vcmp.eq.f32.partialorder %v571_v23, 8.507059e+37 }
 0x807   :  { %v589_v28 = vor.u32 1.1754944e-38, %v588_v22  ;;  %vm587_vm8 = vcmp.eq.f32.partialorder %v586_v24, 8.507059e+37 }
 0x80a   :  { %v1367_v13 = vpop.eup %1366 }
 0x80b   :  { %v1369_v14 = vpop.eup %1368  ;;  %v563_v15 = vmul.f32 %v1367_v13, %v560_v11  ;;  %vm568_vm15 = vweird.f32 %v1367_v13 }
 0x80c   :  { %v578_v3 = vmul.f32 %v1369_v14, %v561_v12  ;;  %vm583_vm0 = vweird.f32 %v1369_v14  ;;  %vm569_vm5 = vmor %vm567_vm3, %vm568_vm15 }
 0x80d   :  { %v564_v5 = vsub.f32 1.0, %v563_v15  ;;  %vm584_vm6 = vmor %vm582_vm4, %vm583_vm0 }
 0x80e   :  { %v579_v7 = vsub.f32 1.0, %v578_v3 }
 0x80f   :  { %v565_v9 = vmul.f32 %v1367_v13, %v564_v5 }
 0x810   :  { %v580_v16 = vmul.f32 %v1369_v14, %v579_v7 }
 0x811   :  { %v566_v18 = vadd.f32 %v1367_v13, %v565_v9 }
 0x812   :  { %v581_v19 = vadd.f32 %v1369_v14, %v580_v16 }
 0x813   :  { %v570_v25 = vsel %vm569_vm5, %v1367_v13, %v566_v18 }
 0x814   :  { %v585_v26 = vsel %vm584_vm6, %v1369_v14, %v581_v19  ;;  %v575_v30 = vsel %vm572_vm7, %v574_v27, %v570_v25 }
 0x815   :  { %v590_v32 = vsel %vm587_vm8, %v589_v28, %v585_v26  ;;  %v600_v36 = vmul.f32 %v596_v35, %v575_v30 }
 0x816   :  { %v601_v41 = vmul.f32 %v597_v40, %v590_v32 }
 0x872   :  { %v605_v29 = vpop.permute.xlu0 %604 }
 0x873   :  { %v607_v31 = vpop.permute.xlu1 %606  ;;  %v610_v33 = vmul.f32 %v605_v29, %v575_v30 }
 0x874   :  { %v611_v34 = vmul.f32 %v607_v31, %v590_v32 }
 0x875   :  { %614 = vrot.lane.b32.xlu2 %v610_v33, %s1581_s3 }
 0x876   :  { %616 = vrot.lane.b32.xlu0 %v611_v34, %s1581_s3 }
 0x8cf   :  { %v615_v37 = vpop.permute.xlu2 %614 }
 0x8d0   :  { %v1758_v38 = vadd.f32 %v615_v37, %v600_v36 }
 0x8d2   :  { %1370 = vtanh.f32 %v1758_v38  ;;  %v721_v40 = vrot.slane %v1758_v38, 7 }
 0x8d8   :  { %v1371_v39 = vpop.eup %1370 }
 0x8d9   :  { %626 = vrot.lane.b32.xlu1 %v1371_v39, %s1580_s2 }
 0x8e8   :  { %v617_v42 = vpop.permute.xlu0 %616 }
 0x8e9   :  { %v1763_v43 = vadd.f32 %v617_v42, %v601_v41 }
 0x8eb   :  { %1372 = vtanh.f32 %v1763_v43  ;;  %v722_v34 = vrot.slane %v1763_v43, 7 }
 0x8f1   :  { %v1373_v46 = vpop.eup %1372 }
 0x8f2   :  { %628 = vrot.lane.b32.xlu2 %v1373_v46, %s1580_s2 }
 0x94b   :  { %v627_v44 = vpop.permute.xlu1 %626 }
 0x94c   :  { %v629_v48 = vpop.permute.xlu2 %628  ;;  %v1767_v49 = vmul.f32 %v627_v44, %v575_v30 }
 0x94d   :  { %v1769_v47 = vmul.f32 %v629_v48, %v590_v32 }
 0x94e   :  { %v645_v52 = vrot.slane %v1767_v49, 3 }
 0x94f   :  { %v646_v53 = vrot.slane %v1769_v47, 2 }
 0x951   :  { %v647_v45 = vsel %vm273_vm11, %v646_v53, %v645_v52 }
 0x952   :  { %648 = vrot.lane.b32.xlu0 %v647_v45, %s1581_s3 }
 0x9c4   :  { %v649_v54 = vpop.permute.xlu0 %648 }
 0x9c5   :  { %1284 = vmatmul.msk.f32.vlgmr.msra.gmra.mxu3 %vm157_vm2, %v649_v54 }
 0xa48   :  { %v669_v55 = vpop.f32.mrf.mxu3 }
 0xa49   :  { %v673_v58 = vrot.slane %v669_v55, 4  ;;  %v674_v59 = vrot.slane %v669_v55, 5 }
 0xa4b   :  { %v677_v60 = vadd.f32 %v673_v58, %v1673_v21  ;;  %v678_v61 = vadd.f32 %v674_v59, %v1670_v17 }
 0xa4d   :  { %1374 = vtanh.f32 %v677_v60  ;;  %v1286_v1 = vmul.f32 -1.442695, %v678_v61  ;;  %v1285_v10 = vmul.f32 -1.442695, %v677_v60 }
 0xa4e   :  { %1376 = vtanh.f32 %v678_v61 }
 0xa4f   :  { %1378 = vpow2.f32 %v1286_v1 }
 0xa53   :  { %v1375_v62 = vpop.eup %1374 }
 0xa54   :  { %v1377_v63 = vpop.eup %1376  ;;  %729 = vrot.lane.b32.xlu1 %v1375_v62, %s1580_s2 }
 0xa55   :  { %731 = vrot.lane.b32.xlu2 %v1377_v63, %s1580_s2  ;;  %v1379_v2 = vpop.eup %1378 }
 0xa56   :  { %v686_v6 = vadd.f32 1.0, %v1379_v2 }
 0xa58   :  { %1380 = vrcp.f32 %v686_v6  ;;  %v713_v5 = vand.u32 2147483648, %v686_v6  ;;  %vm707_vm10 = vweird.f32 %v686_v6  ;;  %v711_v7 = vand.u32 2147483647, %v686_v6 }
 0xa59   :  { %1382 = vpow2.f32 %v1285_v10 }
 0xa5a   :  { %v714_v16 = vor.u32 1.1754944e-38, %v713_v5  ;;  %vm712_vm13 = vcmp.eq.f32.partialorder %v711_v7, 8.507059e+37 }
 0xa5e   :  { %v1381_v8 = vpop.eup %1380 }
 0xa5f   :  { %v703_v11 = vmul.f32 %v1381_v8, %v686_v6  ;;  %v1383_v13 = vpop.eup %1382  ;;  %vm708_vm9 = vweird.f32 %v1381_v8 }
 0xa60   :  { %v685_v15 = vadd.f32 1.0, %v1383_v13  ;;  %vm709_vm12 = vmor %vm707_vm10, %vm708_vm9 }
 0xa61   :  { %v704_v12 = vsub.f32 1.0, %v703_v11 }
 0xa62   :  { %1384 = vrcp.f32 %v685_v15  ;;  %v698_v27 = vand.u32 2147483648, %v685_v15  ;;  %vm692_vm15 = vweird.f32 %v685_v15  ;;  %v696_v28 = vand.u32 2147483647, %v685_v15 }
 0xa63   :  { %v705_v14 = vmul.f32 %v1381_v8, %v704_v12 }
 0xa64   :  { %v699_v30 = vor.u32 1.1754944e-38, %v698_v27  ;;  %vm697_vm3 = vcmp.eq.f32.partialorder %v696_v28, 8.507059e+37 }
 0xa65   :  { %v706_v3 = vadd.f32 %v1381_v8, %v705_v14 }
 0xa67   :  { %v710_v9 = vsel %vm709_vm12, %v1381_v8, %v706_v3 }
 0xa68   :  { %v715_v19 = vsel %vm712_vm13, %v714_v16, %v710_v9  ;;  %v1385_v20 = vpop.eup %1384 }
 0xa69   :  { %v688_v23 = vmul.f32 %v1385_v20, %v685_v15  ;;  %vm693_vm14 = vweird.f32 %v1385_v20  ;;  %v726_v35 = vmul.f32 %v722_v34, %v715_v19 }
 0xa6a   :  { %vm694_vm0 = vmor %vm692_vm15, %vm693_vm14 }
 0xa6b   :  { %v689_v24 = vsub.f32 1.0, %v688_v23 }
 0xa6d   :  { %v690_v25 = vmul.f32 %v1385_v20, %v689_v24 }
 0xa6f   :  { %v691_v26 = vadd.f32 %v1385_v20, %v690_v25 }
 0xa71   :  { %v695_v29 = vsel %vm694_vm0, %v1385_v20, %v691_v26 }
 0xa72   :  { %v700_v32 = vsel %vm697_vm3, %v699_v30, %v695_v29 }
 0xa73   :  { %v725_v41 = vmul.f32 %v721_v40, %v700_v32 }
 0xaaf   :  { %v732_v18 = vpop.permute.xlu2 %731 }
 0xab0   :  { %v736_v22 = vmul.f32 %v732_v18, %v715_v19 }
 0xab2   :  { %741 = vrot.lane.b32.xlu1 %v736_v22, %s1581_s3 }
 0xac6   :  { %v730_v31 = vpop.permute.xlu1 %729 }
 0xac7   :  { %v735_v33 = vmul.f32 %v730_v31, %v700_v32 }
 0xac9   :  { %739 = vrot.lane.b32.xlu0 %v735_v33, %s1581_s3 }
 0xb24   :  { %v742_v36 = vpop.permute.xlu1 %741 }
 0xb25   :  { %v1783_v37 = vadd.f32 %v742_v36, %v726_v35 }
 0xb27   :  { %1386 = vtanh.f32 %v1783_v37  ;;  %v847_v36 = vrot.slane %v1783_v37, 7 }
 0xb2d   :  { %v1387_v39 = vpop.eup %1386 }
 0xb2e   :  { %753 = vrot.lane.b32.xlu0 %v1387_v39, %s1580_s2 }
 0xb3b   :  { %v740_v42 = vpop.permute.xlu0 %739 }
 0xb3c   :  { %v1788_v46 = vadd.f32 %v740_v42, %v725_v41 }
 0xb3e   :  { %1388 = vtanh.f32 %v1788_v46  ;;  %v846_v35 = vrot.slane %v1788_v46, 7 }
 0xb44   :  { %v1389_v44 = vpop.eup %1388 }
 0xb45   :  { %751 = vrot.lane.b32.xlu2 %v1389_v44, %s1580_s2 }
 0xb9f   :  { %v752_v43 = vpop.permute.xlu2 %751 }
 0xba0   :  { %v754_v48 = vpop.permute.xlu0 %753  ;;  %v1792_v52 = vmul.f32 %v752_v43, %v700_v32 }
 0xba1   :  { %v1794_v53 = vmul.f32 %v754_v48, %v715_v19 }
 0xba2   :  { %v770_v45 = vrot.slane %v1792_v52, 4 }
 0xba3   :  { %v771_v54 = vrot.slane %v1794_v53, 3 }
 0xba5   :  { %v772_v38 = vsel %vm273_vm11, %v771_v54, %v770_v45 }
 0xba6   :  { %773 = vrot.lane.b32.xlu1 %v772_v38, %s1581_s3 }
 0xc18   :  { %v774_v55 = vpop.permute.xlu1 %773 }
 0xc19   :  { %1287 = vmatmul.msk.f32.vlgmr.msrb.gmra.mxu0 %vm157_vm2, %v774_v55 }
 0xc96   :  { %v794_v58 = vpop.f32.mrf.mxu0 }
 0xc97   :  { %v798_v59 = vrot.slane %v794_v58, 3  ;;  %v799_v60 = vrot.slane %v794_v58, 4 }
 0xc99   :  { %v802_v61 = vadd.f32 %v798_v59, %v1673_v21  ;;  %v803_v62 = vadd.f32 %v799_v60, %v1670_v17 }
 0xc9b   :  { %1390 = vtanh.f32 %v802_v61  ;;  %v1288_v2 = vmul.f32 -1.442695, %v802_v61  ;;  %v1289_v11 = vmul.f32 -1.442695, %v803_v62 }
 0xc9c   :  { %1392 = vtanh.f32 %v803_v62 }
 0xc9d   :  { %1394 = vpow2.f32 %v1288_v2 }
 0xca1   :  { %v1391_v63 = vpop.eup %1390 }
 0xca2   :  { %v1393_v1 = vpop.eup %1392  ;;  %854 = vrot.lane.b32.xlu2 %v1391_v63, %s1580_s2 }
 0xca3   :  { %856 = vrot.lane.b32.xlu0 %v1393_v1, %s1580_s2  ;;  %v1395_v6 = vpop.eup %1394 }
 0xca4   :  { %v810_v8 = vadd.f32 1.0, %v1395_v6 }
 0xca6   :  { %1396 = vrcp.f32 %v810_v8  ;;  %v823_v7 = vand.u32 2147483648, %v810_v8  ;;  %vm817_vm5 = vweird.f32 %v810_v8  ;;  %v821_v9 = vand.u32 2147483647, %v810_v8 }
 0xca7   :  { %1398 = vpow2.f32 %v1289_v11 }
 0xca8   :  { %v824_v18 = vor.u32 1.1754944e-38, %v823_v7  ;;  %vm822_vm7 = vcmp.eq.f32.partialorder %v821_v9, 8.507059e+37 }
 0xcac   :  { %v1397_v10 = vpop.eup %1396 }
 0xcad   :  { %v813_v12 = vmul.f32 %v1397_v10, %v810_v8  ;;  %v1399_v15 = vpop.eup %1398  ;;  %vm818_vm4 = vweird.f32 %v1397_v10 }
 0xcae   :  { %v811_v3 = vadd.f32 1.0, %v1399_v15  ;;  %vm819_vm6 = vmor %vm817_vm5, %vm818_vm4 }
 0xcaf   :  { %v814_v13 = vsub.f32 1.0, %v813_v12 }
 0xcb0   :  { %1400 = vrcp.f32 %v811_v3  ;;  %v838_v28 = vand.u32 2147483648, %v811_v3  ;;  %vm832_vm9 = vweird.f32 %v811_v3  ;;  %v836_v29 = vand.u32 2147483647, %v811_v3 }
 0xcb1   :  { %v815_v14 = vmul.f32 %v1397_v10, %v814_v13 }
 0xcb2   :  { %v839_v31 = vor.u32 1.1754944e-38, %v838_v28  ;;  %vm837_vm12 = vcmp.eq.f32.partialorder %v836_v29, 8.507059e+37 }
 0xcb3   :  { %v816_v5 = vadd.f32 %v1397_v10, %v815_v14 }
 0xcb5   :  { %v820_v16 = vsel %vm819_vm6, %v1397_v10, %v816_v5 }
 0xcb6   :  { %v825_v20 = vsel %vm822_vm7, %v824_v18, %v820_v16  ;;  %v1401_v23 = vpop.eup %1400 }
 0xcb7   :  { %v828_v24 = vmul.f32 %v1401_v23, %v811_v3  ;;  %vm833_vm8 = vweird.f32 %v1401_v23  ;;  %v850_v39 = vmul.f32 %v846_v35, %v825_v20 }
 0xcb8   :  { %vm834_vm10 = vmor %vm832_vm9, %vm833_vm8 }
 0xcb9   :  { %v829_v25 = vsub.f32 1.0, %v828_v24 }
 0xcbb   :  { %v830_v26 = vmul.f32 %v1401_v23, %v829_v25 }
 0xcbd   :  { %v831_v27 = vadd.f32 %v1401_v23, %v830_v26 }
 0xcbf   :  { %v835_v30 = vsel %vm834_vm10, %v1401_v23, %v831_v27 }
 0xcc0   :  { %v840_v33 = vsel %vm837_vm12, %v839_v31, %v835_v30 }
 0xcc1   :  { %v851_v40 = vmul.f32 %v847_v36, %v840_v33 }
 0xcfc   :  { %v855_v19 = vpop.permute.xlu2 %854 }
 0xcfd   :  { %v860_v22 = vmul.f32 %v855_v19, %v825_v20 }
 0xcff   :  { %864 = vrot.lane.b32.xlu1 %v860_v22, %s1581_s3 }
 0xd15   :  { %v857_v32 = vpop.permute.xlu0 %856 }
 0xd16   :  { %v861_v34 = vmul.f32 %v857_v32, %v840_v33 }
 0xd18   :  { %866 = vrot.lane.b32.xlu2 %v861_v34, %s1581_s3 }
 0xd71   :  { %v865_v41 = vpop.permute.xlu1 %864 }
 0xd72   :  { %v867_v42 = vpop.permute.xlu2 %866  ;;  %v1809_v44 = vadd.f32 %v865_v41, %v850_v39 }
 0xd73   :  { %v1811_v43 = vadd.f32 %v867_v42, %v851_v40 }
 0xd74   :  { %1402 = vtanh.f32 %v1809_v44  ;;  %v971_v40 = vrot.slane %v1809_v44, 7 }
 0xd75   :  { %1404 = vtanh.f32 %v1811_v43 }
 0xd7a   :  { %v1403_v48 = vpop.eup %1402 }
 0xd7b   :  { %v1405_v45 = vpop.eup %1404  ;;  %876 = vrot.lane.b32.xlu0 %v1403_v48, %s1580_s2 }
 0xd7c   :  { %878 = vrot.lane.b32.xlu1 %v1405_v45, %s1580_s2 }
 0xded   :  { %v877_v46 = vpop.permute.xlu0 %876 }
 0xdee   :  { %v879_v37 = vpop.permute.xlu1 %878  ;;  %v1817_v54 = vmul.f32 %v877_v46, %v825_v20  ;;  %v972_v46 = vrot.slane %v1811_v43, 7 }
 0xdef   :  { %v1819_v38 = vmul.f32 %v879_v37, %v840_v33 }
 0xdf0   :  { %v895_v55 = vrot.slane %v1817_v54, 5 }
 0xdf1   :  { %v896_v58 = vrot.slane %v1819_v38, 4 }
 0xdf3   :  { %v897_v59 = vsel %vm273_vm11, %v896_v58, %v895_v55 }
 0xdf4   :  { %898 = vrot.lane.b32.xlu2 %v897_v59, %s1581_s3 }
 0xe4e   :  { %v899_v60 = vpop.permute.xlu2 %898 }
 0xe4f   :  { %1290 = vmatmul.msk.f32.vlgmr.msrb.gmra.mxu1 %vm157_vm2, %v899_v60 }
 0xecc   :  { %v919_v61 = vpop.f32.mrf.mxu1 }
 0xecd   :  { %v923_v62 = vrot.slane %v919_v61, 2  ;;  %v924_v63 = vrot.slane %v919_v61, 3 }
 0xecf   :  { %v927_v1 = vadd.f32 %v923_v62, %v1673_v21  ;;  %v928_v2 = vadd.f32 %v924_v63, %v1670_v17 }
 0xed1   :  { %1406 = vtanh.f32 %v927_v1  ;;  %v1291_v10 = vmul.f32 -1.442695, %v927_v1  ;;  %v1292_v11 = vmul.f32 -1.442695, %v928_v2 }
 0xed2   :  { %1408 = vtanh.f32 %v928_v2 }
 0xed3   :  { %1410 = vpow2.f32 %v1291_v10 }
 0xed4   :  { %1412 = vpow2.f32 %v1292_v11 }
 0xed7   :  { %v1407_v6 = vpop.eup %1406 }
 0xed8   :  { %v1409_v8 = vpop.eup %1408  ;;  %979 = vrot.lane.b32.xlu0 %v1407_v6, %s1580_s2 }
 0xed9   :  { %981 = vrot.lane.b32.xlu1 %v1409_v8, %s1580_s2  ;;  %v1411_v12 = vpop.eup %1410 }
 0xeda   :  { %v1413_v13 = vpop.eup %1412  ;;  %v935_v14 = vadd.f32 1.0, %v1411_v12 }
 0xedb   :  { %v936_v15 = vadd.f32 1.0, %v1413_v13 }
 0xedc   :  { %1414 = vrcp.f32 %v935_v14  ;;  %v948_v24 = vand.u32 2147483648, %v935_v14  ;;  %vm942_vm15 = vweird.f32 %v935_v14  ;;  %v946_v26 = vand.u32 2147483647, %v935_v14 }
 0xedd   :  { %1416 = vrcp.f32 %v936_v15  ;;  %v963_v25 = vand.u32 2147483648, %v936_v15  ;;  %vm957_vm0 = vweird.f32 %v936_v15  ;;  %v961_v27 = vand.u32 2147483647, %v936_v15 }
 0xede   :  { %v949_v30 = vor.u32 1.1754944e-38, %v948_v24  ;;  %vm947_vm5 = vcmp.eq.f32.partialorder %v946_v26, 8.507059e+37 }
 0xedf   :  { %v964_v31 = vor.u32 1.1754944e-38, %v963_v25  ;;  %vm962_vm6 = vcmp.eq.f32.partialorder %v961_v27, 8.507059e+37 }
 0xee2   :  { %v1415_v3 = vpop.eup %1414 }
 0xee3   :  { %v1417_v5 = vpop.eup %1416  ;;  %v938_v7 = vmul.f32 %v1415_v3, %v935_v14  ;;  %vm943_vm13 = vweird.f32 %v1415_v3 }
 0xee4   :  { %v953_v9 = vmul.f32 %v1417_v5, %v936_v15  ;;  %vm958_vm14 = vweird.f32 %v1417_v5  ;;  %vm944_vm3 = vmor %vm942_vm15, %vm943_vm13  ;;  %vm269_vm15 = vcmask 253952  }
 0xee5   :  { %v939_v16 = vsub.f32 1.0, %v938_v7  ;;  %vm959_vm4 = vmor %vm957_vm0, %vm958_vm14  ;;  %vm642_vm0 = vcmask 257027  }
 0xee6   :  { %v954_v18 = vsub.f32 1.0, %v953_v9 }
 0xee7   :  { %v940_v19 = vmul.f32 %v1415_v3, %v939_v16 }
 0xee8   :  { %v955_v20 = vmul.f32 %v1417_v5, %v954_v18 }
 0xee9   :  { %v941_v22 = vadd.f32 %v1415_v3, %v940_v19 }
 0xeea   :  { %v956_v23 = vadd.f32 %v1417_v5, %v955_v20 }
 0xeeb   :  { %v945_v28 = vsel %vm944_vm3, %v1415_v3, %v941_v22  ;;  %vm1017_vm3 = vcmask 260102  }
 0xeec   :  { %v960_v29 = vsel %vm959_vm4, %v1417_v5, %v956_v23  ;;  %v950_v33 = vsel %vm947_vm5, %v949_v30, %v945_v28  ;;  %vm393_vm4 = vcmask 254977   ;;  %vm767_vm5 = vcmask 258052  }
 0xeed   :  { %v965_v35 = vsel %vm962_vm6, %v964_v31, %v960_v29  ;;  %v975_v41 = vmul.f32 %v971_v40, %v950_v33  ;;  %vm517_vm6 = vcmask 256002  }
 0xeee   :  { %v976_v37 = vmul.f32 %v972_v46, %v965_v35 }
 0xf4a   :  { %v980_v32 = vpop.permute.xlu0 %979 }
 0xf4b   :  { %v982_v34 = vpop.permute.xlu1 %981  ;;  %v985_v36 = vmul.f32 %v980_v32, %v950_v33 }
 0xf4c   :  { %v986_v39 = vmul.f32 %v982_v34, %v965_v35 }
 0xf4d   :  { %989 = vrot.lane.b32.xlu2 %v985_v36, %s1581_s3 }
 0xf4e   :  { %991 = vrot.lane.b32.xlu0 %v986_v39, %s1581_s3 }
 0xfa7   :  { %v990_v42 = vpop.permute.xlu2 %989 }
 0xfa8   :  { %v1833_v48 = vadd.f32 %v990_v42, %v975_v41 }
 0xfaa   :  { %1418 = vtanh.f32 %v1833_v48 }
 0xfb0   :  { %v1419_v45 = vpop.eup %1418 }
 0xfb1   :  { %1001 = vrot.lane.b32.xlu1 %v1419_v45, %s1580_s2 }
 0xfc0   :  { %v992_v55 = vpop.permute.xlu0 %991 }
 0xfc1   :  { %v1838_v58 = vadd.f32 %v992_v55, %v976_v37 }
 0xfc3   :  { %1420 = vtanh.f32 %v1838_v58 }
 0xfc9   :  { %v1421_v59 = vpop.eup %1420 }
 0xfca   :  { %1003 = vrot.lane.b32.xlu2 %v1421_v59, %s1580_s2 }
0x1023   :  { %v1002_v44 = vpop.permute.xlu1 %1001 }
0x1024   :  { %v1004_v60 = vpop.permute.xlu2 %1003  ;;  %v1842_v61 = vmul.f32 %v1002_v44, %v950_v33 }
0x1025   :  { %v1844_v62 = vmul.f32 %v1004_v60, %v965_v35 }
0x1026   :  { %v1020_v63 = vrot.slane %v1842_v61, 6 }
0x1027   :  { %v1021_v1 = vrot.slane %v1844_v62, 5 }
0x1029   :  { %v1022_v43 = vsel %vm273_vm11, %v1021_v1, %v1020_v63 }
0x102a   :  { %1023 = vrot.lane.b32.xlu0 %v1022_v43, %s1581_s3 }
0x109c   :  { %v1024_v2 = vpop.permute.xlu0 %1023 }
0x109d   :  { %1293 = vmatmul.msk.f32.vlgmr.msra.gmra.mxu2 %vm157_vm2, %v1024_v2 }
0x1120   :  { %v1044_v6 = vpop.f32.mrf.mxu2 }
0x1121   :  { %v1048_v8 = vrot.slane %v1044_v6, 1  ;;  %v1049_v10 = vrot.slane %v1044_v6, 2 }
0x1123   :  { %v1052_v11 = vadd.f32 %v1048_v8, %v1673_v21  ;;  %v1053_v12 = vadd.f32 %v1049_v10, %v1670_v17  ;;  %v90_v8 = vld [vmem:[#allocation8 + $0x58] sm:$0xff]  ;;  %v88_v10 = vld [vmem:[#allocation8 + $0x48] sm:$0xff] }
0x1124   :  { %1168 = vmatpush.msrb.mxu3 %v90_v8 }
0x1125   :  { %1422 = vtanh.f32 %v1052_v11  ;;  %v1295_v15 = vmul.f32 -1.442695, %v1053_v12  ;;  %v1294_v9 = vmul.f32 -1.442695, %v1052_v11  ;;  %v87_v11 = vld [vmem:[#allocation8 + $0x40] sm:$0xff] }
0x1126   :  { %1424 = vtanh.f32 %v1053_v12 }
0x1127   :  { %1426 = vpow2.f32 %v1295_v15 }
0x112b   :  { %v1423_v13 = vpop.eup %1422 }
0x112c   :  { %v1425_v14 = vpop.eup %1424  ;;  %1104 = vrot.lane.b32.xlu1 %v1423_v13, %s1580_s2 }
0x112d   :  { %1106 = vrot.lane.b32.xlu2 %v1425_v14, %s1580_s2  ;;  %v1427_v3 = vpop.eup %1426 }
0x112e   :  { %v1061_v5 = vadd.f32 1.0, %v1427_v3 }
0x1130   :  { %1428 = vrcp.f32 %v1061_v5  ;;  %v1088_v22 = vand.u32 2147483648, %v1061_v5  ;;  %vm1082_vm7 = vweird.f32 %v1061_v5  ;;  %v1086_v23 = vand.u32 2147483647, %v1061_v5 }
0x1131   :  { %1430 = vpow2.f32 %v1294_v9 }
0x1132   :  { %v1089_v25 = vor.u32 1.1754944e-38, %v1088_v22  ;;  %vm1087_vm9 = vcmp.eq.f32.partialorder %v1086_v23, 8.507059e+37 }
0x1136   :  { %v1429_v7 = vpop.eup %1428 }
0x1137   :  { %v1078_v16 = vmul.f32 %v1429_v7, %v1061_v5  ;;  %v1431_v18 = vpop.eup %1430  ;;  %vm1083_vm11 = vweird.f32 %v1429_v7  ;;  %v1309_v5 = vld [vmem:[#allocation9 + $0x2] ss:$0 sm:$0xff] }
0x1138   :  { %v1060_v19 = vadd.f32 1.0, %v1431_v18  ;;  %vm1084_vm8 = vmor %vm1082_vm7, %vm1083_vm11  ;;  %vm892_vm11 = vcmask 259077   ;;  %vm1142_vm7 = vcmask 261127  }
0x1139   :  { %v1079_v21 = vsub.f32 1.0, %v1078_v16 }
0x113a   :  { %1432 = vrcp.f32 %v1060_v19  ;;  %v1073_v34 = vand.u32 2147483648, %v1060_v19  ;;  %vm1067_vm12 = vweird.f32 %v1060_v19  ;;  %v1071_v35 = vand.u32 2147483647, %v1060_v19 }
0x113b   :  { %v1080_v17 = vmul.f32 %v1429_v7, %v1079_v21 }
0x113c   :  { %v1074_v39 = vor.u32 1.1754944e-38, %v1073_v34  ;;  %vm1072_vm14 = vcmp.eq.f32.partialorder %v1071_v35, 8.507059e+37 }
0x113d   :  { %v1081_v20 = vadd.f32 %v1429_v7, %v1080_v17 }
0x113f   :  { %v1085_v24 = vsel %vm1084_vm8, %v1429_v7, %v1081_v20 }
0x1140   :  { %v1855_v27 = vsel %vm1087_vm9, %v1089_v25, %v1085_v24  ;;  %v1433_v28 = vpop.eup %1432 }
0x1141   :  { %v1063_v30 = vmul.f32 %v1433_v28, %v1060_v19  ;;  %vm1068_vm10 = vweird.f32 %v1433_v28  ;;  %v1185_v19 = vlaneseq }
0x1142   :  { %vm1069_vm13 = vmor %vm1067_vm12, %vm1068_vm10  ;;  %vm1221_vm12 = vcmask 7168  }
0x1143   :  { %v1064_v31 = vsub.f32 1.0, %v1063_v30  ;;  %v1186_v20 = vand.u32 127, %v1185_v19 }
0x1145   :  { %v1065_v32 = vmul.f32 %v1433_v28, %v1064_v31 }
0x1147   :  { %v1066_v33 = vadd.f32 %v1433_v28, %v1065_v32 }
0x1149   :  { %v1070_v36 = vsel %vm1069_vm13, %v1433_v28, %v1066_v33 }
0x114a   :  { %v1075_v41 = vsel %vm1072_vm14, %v1074_v39, %v1070_v36 }
0x1187   :  { %v1107_v26 = vpop.permute.xlu2 %1106 }
0x1188   :  { %v1111_v29 = vmul.f32 %v1107_v26, %v1855_v27 }
0x118a   :  { %1116 = vrot.lane.b32.xlu1 %v1111_v29, %s1581_s3 }
0x1192   :  { %263 = vrot.lane.b32.xlu1 %v1691_v4, %s1581_s3  ;;  %v1097_v4 = vrot.slane %v1838_v58, 7 }
0x119a   :  { %636 = vrot.lane.b32.xlu1 %v1767_v49, %s1581_s3  ;;  %v1101_v49 = vmul.f32 %v1097_v4, %v1855_v27 }
0x119e   :  { %v1105_v40 = vpop.permute.xlu1 %1104 }
0x119f   :  { %v1110_v42 = vmul.f32 %v1105_v40, %v1075_v41 }
0x11a1   :  { %1114 = vrot.lane.b32.xlu0 %v1110_v42, %s1581_s3 }
0x11a2   :  { %1011 = vrot.lane.b32.xlu1 %v1842_v61, %s1581_s3 }
0x11aa   :  { %389 = vrot.lane.b32.xlu1 %v1719_v57, %s1581_s3  ;;  %v1096_v57 = vrot.slane %v1833_v48, 7 }
0x11b2   :  { %763 = vrot.lane.b32.xlu1 %v1794_v53, %s1581_s3  ;;  %v1100_v53 = vmul.f32 %v1096_v57, %v1075_v41 }
0x11fc   :  { %v1117_v45 = vpop.permute.xlu1 %1116 }
0x11fd   :  { %v1121_v46 = vadd.f32 %v1117_v45, %v1101_v49 }
0x11ff   :  { %1434 = vtanh.f32 %v1121_v46 }
0x1204   :  { %v264_v37 = vpop.permute.xlu1 %263 }
0x1205   :  { %v1435_v55 = vpop.eup %1434  ;;  %270 = vst.msk [vmem:[#allocation2] sm:$0x1] %vm269_vm15, %v264_v37 }
0x1206   :  { %1128 = vrot.lane.b32.xlu0 %v1435_v55, %s1580_s2 }
0x120c   :  { %v637_v59 = vpop.permute.xlu1 %636 }
0x120d   :  { %643 = vst.msk [vmem:[#allocation2] sm:$0x8] %vm642_vm0, %v637_v59 }
0x120e   :  { %511 = vrot.lane.b32.xlu0 %v1742_v50, %s1581_s3 }
0x1213   :  { %v1115_v58 = vpop.permute.xlu0 %1114 }
0x1214   :  { %v1012_v44 = vpop.permute.xlu1 %1011  ;;  %v1120_v60 = vadd.f32 %v1115_v58, %v1100_v53 }
0x1215   :  { %1018 = vst.msk [vmem:[#allocation2] sm:$0x40] %vm1017_vm3, %v1012_v44 }
0x1216   :  { %1436 = vtanh.f32 %v1120_v60  ;;  %886 = vrot.lane.b32.xlu0 %v1817_v54, %s1581_s3 }
0x121c   :  { %v1437_v61 = vpop.eup %1436  ;;  %v390_v63 = vpop.permute.xlu1 %389 }
0x121d   :  { %395 = vst.msk [vmem:[#allocation2 + $0x8] sm:$0x2] %vm393_vm4, %v390_v63  ;;  %1126 = vrot.lane.b32.xlu2 %v1437_v61, %s1580_s2 }
0x121e   :  { %265 = vrot.lane.b32.xlu0 %v1688_v0, %s1581_s3 }
0x1224   :  { %v764_v50 = vpop.permute.xlu1 %763 }
0x1225   :  { %769 = vst.msk [vmem:[#allocation2 + $0x8] sm:$0x10] %vm767_vm5, %v764_v50  ;;  %387 = vrot.lane.b32.xlu2 %v1717_v56, %s1581_s3 }
0x1226   :  { %638 = vrot.lane.b32.xlu0 %v1769_v47, %s1581_s3 }
0x122d   :  { %761 = vrot.lane.b32.xlu2 %v1792_v52, %s1581_s3 }
0x122e   :  { %1013 = vrot.lane.b32.xlu0 %v1844_v62, %s1581_s3 }
0x1235   :  { %513 = vrot.lane.b32.xlu2 %v1744_v51, %s1581_s3 }
0x1277   :  { %v1127_v0 = vpop.permute.xlu2 %1126 }
0x1278   :  { %v1129_v54 = vpop.permute.xlu0 %1128  ;;  %v1132_v48 = vmul.f32 %v1127_v0, %v1075_v41 }
0x1279   :  { %v1133_v1 = vmul.f32 %v1129_v54, %v1855_v27 }
0x127a   :  { %1136 = vrot.lane.b32.xlu2 %v1132_v48, %s1581_s3 }
0x127b   :  { %1138 = vrot.lane.b32.xlu1 %v1133_v1, %s1581_s3 }
0x127f   :  { %v388_v56 = vpop.permute.xlu2 %387 }
0x1280   :  { %v512_v47 = vpop.permute.xlu0 %511  ;;  %394 = vst.msk [vmem:[#allocation2] sm:$0x2] %vm393_vm4, %v388_v56 }
0x1281   :  { %518 = vst.msk [vmem:[#allocation2] sm:$0x4] %vm517_vm6, %v512_v47 }
0x1282   :  { %888 = vrot.lane.b32.xlu2 %v1819_v38, %s1581_s3  ;;  %v89_v38 = vld [vmem:[#allocation8 + $0x50] sm:$0xff] }
0x1283   :  { %1169 = vmatpush.msrb.mxu3 %v89_v38 }
0x1285   :  { %1170 = vmatpush.msrb.mxu3 %v88_v10 }
0x1287   :  { %v762_v51 = vpop.permute.xlu2 %761  ;;  %1171 = vmatpush.msrb.mxu3 %v87_v11 }
0x1288   :  { %v887_v52 = vpop.permute.xlu0 %886  ;;  %768 = vst.msk [vmem:[#allocation2] sm:$0x10] %vm767_vm5, %v762_v51 }
0x1289   :  { %893 = vst.msk [vmem:[#allocation2] sm:$0x20] %vm892_vm11, %v887_v52 }
0x128f   :  { %v514_v62 = vpop.permute.xlu2 %513 }
0x1290   :  { %v266_v43 = vpop.permute.xlu0 %265  ;;  %519 = vst.msk [vmem:[#allocation2 + $0x8] sm:$0x4] %vm517_vm6, %v514_v62 }
0x1291   :  { %271 = vst.msk [vmem:[#allocation2 + $0x8] sm:$0x1] %vm269_vm15, %v266_v43 }
0x1298   :  { %v639_v2 = vpop.permute.xlu0 %638 }
0x1299   :  { %644 = vst.msk [vmem:[#allocation2 + $0x8] sm:$0x8] %vm642_vm0, %v639_v2 }
0x12a0   :  { %v1014_v6 = vpop.permute.xlu0 %1013 }
0x12a1   :  { %1019 = vst.msk [vmem:[#allocation2 + $0x8] sm:$0x40] %vm1017_vm3, %v1014_v6 }
0x12d4   :  { %v1137_v12 = vpop.permute.xlu2 %1136 }
0x12d5   :  { %1143 = vst.msk [vmem:[#allocation2] sm:$0x80] %vm1142_vm7, %v1137_v12 }
0x12dc   :  { %v889_v13 = vpop.permute.xlu2 %888  ;;  %v1145_v14 = vld [vmem:[#allocation2] sm:$0xff] }
0x12dd   :  { %894 = vst.msk [vmem:[#allocation2 + $0x8] sm:$0x20] %vm892_vm11, %v889_v13  ;;  %1296 = vmatmul.msk.f32.vlgmr.msrb.gmra.mxu3 %vm157_vm2, %v1145_v14 }
0x12ed   :  { %v1139_v15 = vpop.permute.xlu1 %1138 }
0x12ee   :  { %1144 = vst.msk [vmem:[#allocation2 + $0x8] sm:$0x80] %vm1142_vm7, %v1139_v15 }
0x12f5   :  { %v1146_v3 = vld [vmem:[#allocation2 + $0x8] sm:$0xff] }
0x12f6   :  { %1297 = vmatmul.msk.f32.gmra.mxu3 %vm157_vm2, %v1146_v3 }
0x1360   :  { %v1173_v7 = vpop.f32.mrf.mxu3 }
0x1361   :  { %v1174_v9 = vadd.f32 %v1309_v5, %v1173_v7 }
0x1363   :  { %v1179_v16 = vsel %vm127_vm1, %v1174_v9, -inf }
0x1364   :  { %1180 = vmax.xlane.f32.xlu2 %v1179_v16 }
0x1379   :  { %v1176_v21 = vpop.f32.mrf.mxu3 }
0x137a   :  { %v1177_v18 = vadd.f32 %v1309_v5, %v1176_v21 }
0x137c   :  { %v1182_v17 = vsel %vm127_vm1, %v1177_v18, -inf }
0x137d   :  { %1183 = vmax.xlane.f32.xlu0 %v1182_v17 }
0x13d7   :  { %v1181_v22 = vpop.xlane.xlu2 %1180 }
0x13d8   :  { %vm1187_vm8 = vcmp.eq.f32.partialorder %v1174_v9, %v1181_v22  ;;  %v1224_v27 = vsub.f32 %v1174_v9, %v1181_v22 }
0x13d9   :  { %v1189_v23 = vsel %vm1187_vm8, %v1186_v20, 24 }
0x13da   :  { %v1191_v24 = vsel %vm127_vm1, %v1189_v23, 2147483647  ;;  %v1226_v30 = vmul.f32 1.442695, %v1224_v27 }
0x13db   :  { %v1193_v25 = vshra.s32 %v1191_v24, 16  ;;  %v1192_v42 = vand.u32 65535, %v1191_v24 }
0x13dd   :  { %v1195_v26 = vcvt.s32.f32 %v1193_v25  ;;  %v1194_v49 = vcvt.s32.f32 %v1192_v42 }
0x13df   :  { %1196 = vmin.xlane.f32.xlu1 %v1195_v26 }
0x13f0   :  { %v1184_v28 = vpop.xlane.xlu0 %1183 }
0x13f1   :  { %vm1188_vm2 = vcmp.eq.f32.partialorder %v1177_v18, %v1184_v28  ;;  %v1225_v29 = vsub.f32 %v1177_v18, %v1184_v28 }
0x13f2   :  { %v1190_v31 = vsel %vm1188_vm2, %v1186_v20, 24 }
0x13f3   :  { %v1228_v32 = vmul.f32 1.442695, %v1225_v29  ;;  %v1206_v33 = vsel %vm127_vm1, %v1190_v31, 2147483647 }
0x13f4   :  { %v1208_v34 = vshra.s32 %v1206_v33, 16  ;;  %v1207_v46 = vand.u32 65535, %v1206_v33 }
0x13f5   :  { %1438 = vpow2.f32 %v1228_v32 }
0x13f6   :  { %1440 = vpow2.f32 %v1226_v30  ;;  %v1210_v35 = vcvt.s32.f32 %v1208_v34  ;;  %v1209_v55 = vcvt.s32.f32 %v1207_v46 }
0x13f8   :  { %1211 = vmin.xlane.f32.xlu2 %v1210_v35 }
0x13fb   :  { %v1439_v36 = vpop.eup %1438 }
0x13fc   :  { %v1441_v39 = vpop.eup %1440  ;;  %v1233_v40 = vsel %vm127_vm1, %v1439_v36, 0.0 }
0x13fd   :  { %1234 = vadd.xlane.f32.xlu0 %v1233_v40  ;;  %v1230_v41 = vsel %vm127_vm1, %v1441_v39, 0.0 }
0x1400   :  { %1231 = vadd.xlane.f32.xlu2 %v1230_v41 }
0x1452   :  { %v1197_v4 = vpop.xlane.xlu1 %1196 }
0x1453   :  { %vm1198_vm9 = vcmp.eq.f32.partialorder %v1195_v26, %v1197_v4  ;;  %v1203_v0 = vcvt.f32.s32 %v1197_v4 }
0x1454   :  { %v1199_v45 = vsel %vm1198_vm9, %v1194_v49, inf }
0x1455   :  { %1200 = vmin.xlane.f32.xlu1 %v1199_v45  ;;  %v1204_v48 = vshll.u32 %v1203_v0, 16 }
0x146b   :  { %v1212_v37 = vpop.xlane.xlu2 %1211 }
0x146c   :  { %vm1213_vm10 = vcmp.eq.f32.partialorder %v1210_v35, %v1212_v37  ;;  %v1218_v47 = vcvt.f32.s32 %v1212_v37 }
0x146d   :  { %v1214_v59 = vsel %vm1213_vm10, %v1209_v55, inf }
0x146e   :  { %1215 = vmin.xlane.f32.xlu2 %v1214_v59  ;;  %v1219_v52 = vshll.u32 %v1218_v47, 16 }
0x1470   :  { %v1235_v57 = vpop.xlane.xlu0 %1234 }
0x1471   :  { %1442 = vlog2.f32 %v1235_v57 }
0x1473   :  { %v1232_v53 = vpop.xlane.xlu2 %1231 }
0x1474   :  { %1444 = vlog2.f32 %v1232_v53 }
0x1477   :  { %v1443_v58 = vpop.eup %1442 }
0x1478   :  { %v1239_v44 = vmul.f32 0.6931472, %v1443_v58 }
0x147a   :  { %v1445_v60 = vpop.eup %1444  ;;  %v1241_v61 = vsub.f32 %v1225_v29, %v1239_v44 }
0x147b   :  { %v1237_v63 = vmul.f32 0.6931472, %v1445_v60 }
0x147c   :  { %1243 = vst.msk [vmem:[#allocation11 + $0x8] sm:$0xff] %vm127_vm1, %v1241_v61 }
0x147d   :  { %v1240_v50 = vsub.f32 %v1224_v27, %v1237_v63 }
0x147f   :  { %1242 = vst.msk [vmem:[#allocation11] sm:$0xff] %vm127_vm1, %v1240_v50 }
0x1480   :  { %1256 = dma.vmem_to_hbm [thread:$0]  %s1249_s14, 256, %s1251_s17, [#allocation5], %s1576_s28, %s1576_s28, %s1577_s29  }
0x14c8   :  { %v1201_v54 = vpop.xlane.xlu1 %1200 }
0x14c9   :  { %v1202_v1 = vcvt.f32.s32 %v1201_v54 }
0x14cb   :  { %v1205_v56 = vadd.s32 %v1204_v48, %v1202_v1 }
0x14cd   :  { %1222 = vst.msk [vmem:[%s1935_s5] sm:$0xff] %vm1221_vm12, %v1205_v56 }
0x14e1   :  { %v1216_v51 = vpop.xlane.xlu2 %1215 }
0x14e2   :  { %v1217_v62 = vcvt.f32.s32 %v1216_v51 }
0x14e4   :  { %v1220_v43 = vadd.s32 %v1219_v52, %v1217_v62 }
0x14e6   :  { %1223 = vst.msk [vmem:[%s1935_s5 + $0x8] sm:$0xff] %vm1221_vm12, %v1220_v43 }
0x14e7   :  { %1572 = dma.done.wait [#allocation5], 256  }
0x14e8   :  { %1573 = vsyncadd [#allocation5], 4294967040 }
0x14e9   :  { %1265 = vsyncpa [#allocation4], 1 }
0x14ea   :  { %1266 = vsyncpa [#allocation7], 1 }
0x14eb   :  { %1267 = vsyncpa [#allocation10], 1 }
0x14ec   :  { %1268 = vsyncpa [#allocation5], 1 }

</bundles_post_ra>
